<compile_context>
chip_gen: v7x
topology: tpu7x:2x2x1
jax: 0.10.0
libtpu: 0.0.40
codegen_flags: <defaults>
</compile_context>

<pallas_src>
import math

import jax
import jax.numpy as jnp
from jax.experimental import pallas as pl
from jax.experimental.pallas import tpu as pltpu

SELU_ALPHA = 1.6732632423543772848170429916717
SELU_SCALE = 1.0507009873554804934193349852946
LANE = 128  # TPU lane width; feature dims are padded up to this.


def _selu(v):
    # Clamp the exp argument so the discarded branch never produces inf.
    neg = SELU_ALPHA * (jnp.exp(jnp.minimum(v, 0.0)) - 1.0)
    return SELU_SCALE * jnp.where(v > 0.0, v, neg)


# ----------------------------- VMEM budgeting --------------------------------

def _tpu_vmem_capacity_bytes():
    """Per-TensorCore VMEM capacity; conservative (v7x) fallback if unknown."""
    cap = 64 * 1024 * 1024
    try:
        info = pltpu.get_tpu_info()
        for name in ("vmem_capacity_bytes", "vmem_size_bytes", "vmem_bytes"):
            v = getattr(info, name, None)
            if v:
                cap = int(v)
                break
    except Exception:
        pass
    return cap


_VMEM_CAP = _tpu_vmem_capacity_bytes()
# Explicit scoped limit handed to Mosaic (leaves headroom for compiler temporaries).
_VMEM_LIMIT = min(int(_VMEM_CAP * 0.9), 100 * 1024 * 1024)
# Budget used by the tile choosers (must cover every double-buffered operand).
_TILE_BUDGET = min(int(_VMEM_CAP * 0.55), 64 * 1024 * 1024)


def _round_up(x, m):
    return (x + m - 1) // m * m


def _choose_tiles(n, f_p, f_n, budget):
    """Pick (TM, TK) for the fused adj@support kernel.

    The footprint accounts for ALL VMEM consumers of one fused call:
    double-buffered bf16 adj tile, double-buffered bf16 support tile,
    double-buffered output tile, f32 accumulator scratch, the (constant)
    next-weight slab and both biases.
    """
    n_min = _round_up(max(n, 1), 128)

    def footprint(tm, tk):
        return (2 * tm * tk * 2            # adj tile, bf16, double-buffered
                + 2 * tk * f_p * 2         # support tile, bf16, double-buffered
                + 2 * tm * f_n * 4         # output tile (<= f32), double-buffered
                + tm * f_p * 4             # f32 accumulator scratch
                + 2 * f_p * f_n * 2        # next-weight / classifier slab (bf16)
                + 2 * (f_p + f_n) * 4)     # biases

    # Largest power-of-two K tile (caps at 2048 to keep DMAs uniform).
    tk = 128
    while tk * 2 <= min(n_min, 2048):
        tk *= 2
    # Prefer >= 2 row blocks so the "parallel" axis can shard across the two
    # v7x TensorCores (harmless on single-core v5e/v6e).
    tm_cap = max(n_min // 2, 16) if n_min >= 256 else n_min
    tm = 16
    while tm * 2 <= min(tm_cap, 512):
        tm *= 2
    # Shrink until the honest footprint fits the per-generation budget.
    while footprint(tm, tk) > budget and (tm > 16 or tk > 128):
        if tk >= tm and tk > 128:
            tk //= 2
        elif tm > 16:
            tm //= 2
        else:
            tk //= 2
    return tm, tk


def _choose_tm_proj(n_p, in_dim, f_p, budget):
    """Row tile for the x @ W1 projection (bf16 x tile can dominate if in_dim is big)."""
    cap = min(max(n_p // 2, 16), 512) if n_p >= 256 else n_p
    tm = 16
    while tm * 2 <= cap:
        tm *= 2

    def footprint(t):
        return (2 * t * in_dim * 2      # x tile, bf16, double-buffered
                + 2 * in_dim * f_p * 2  # weight slab, bf16
                + 2 * t * f_p * 2)      # output tile, bf16, double-buffered

    while footprint(tm) > budget and tm > 16:
        tm //= 2
    while n_p % tm:
        tm //= 2
    return max(tm, 8)


def _pad2(a, rows, cols):
    r, c = a.shape
    return jnp.pad(a, ((0, rows - r), (0, cols - c)))


# ----------------------------- Pallas kernels --------------------------------

def _proj_kernel(x_ref, w_ref, o_ref):
    # support_tile = x_tile @ W   (bf16 x bf16 -> f32 accumulation on the MXU)
    o_ref[...] = jnp.dot(x_ref[...], w_ref[...],
                         preferred_element_type=jnp.float32).astype(o_ref.dtype)


def _gcn_fused_kernel(adj_ref, sup_ref, b_ref, wn_ref, bn_ref, o_ref, acc_ref):
    k = pl.program_id(1)

    @pl.when(k == 0)
    def _():
        acc_ref[...] = jnp.zeros_like(acc_ref)

    # Dominant matmul: bf16 adj tile x bf16 support tile, f32 accumulation.
    acc_ref[...] += jnp.dot(adj_ref[...], sup_ref[...],
                            preferred_element_type=jnp.float32)

    @pl.when(k == pl.num_programs(1) - 1)
    def _():
        # SELU, then bias AFTER activation (GraphConvolution semantics), then the
        # fused projection into the next operand (W2 or the classifier slab),
        # also bf16 x bf16 with f32 accumulation.
        h = _selu(acc_ref[...]) + b_ref[...]
        o_ref[...] = (jnp.dot(h.astype(jnp.bfloat16), wn_ref[...],
                              preferred_element_type=jnp.float32)
                      + bn_ref[...]).astype(o_ref.dtype)


# ----------------------------- pallas_call wrappers ---------------------------

def _proj_call(x_b, w_b, tm):
    n_p, in_dim = x_b.shape
    f_p = w_b.shape[1]
    return pl.pallas_call(
        _proj_kernel,
        out_shape=jax.ShapeDtypeStruct((n_p, f_p), jnp.bfloat16),
        grid_spec=pltpu.PrefetchScalarGridSpec(
            num_scalar_prefetch=0,
            grid=(n_p // tm,),
            in_specs=[
                pl.BlockSpec((tm, in_dim), lambda i: (i, 0)),
                pl.BlockSpec((in_dim, f_p), lambda i: (0, 0)),
            ],
            out_specs=pl.BlockSpec((tm, f_p), lambda i: (i, 0)),
        ),
        compiler_params=pltpu.CompilerParams(
            dimension_semantics=("parallel",),
            vmem_limit_bytes=_VMEM_LIMIT),
        cost_estimate=pl.CostEstimate(
            flops=2 * n_p * in_dim * f_p,
            transcendentals=0,
            bytes_accessed=(n_p * in_dim + in_dim * f_p + n_p * f_p) * 2),
    )(x_b, w_b)


def _gcn_fused_call(adj_b, sup, b, w_next, b_next, tm, tk, out_dtype):
    n_p = adj_b.shape[0]
    f_p = sup.shape[1]
    f_n = w_next.shape[1]
    out_bytes = jnp.dtype(out_dtype).itemsize
    return pl.pallas_call(
        _gcn_fused_kernel,
        out_shape=jax.ShapeDtypeStruct((n_p, f_n), out_dtype),
        grid_spec=pltpu.PrefetchScalarGridSpec(
            num_scalar_prefetch=0,
            grid=(n_p // tm, n_p // tk),            # rows (parallel), K (arbitrary, last)
            in_specs=[
                pl.BlockSpec((tm, tk), lambda i, k: (i, k)),    # stream adj tiles (bf16)
                pl.BlockSpec((tk, f_p), lambda i, k: (k, 0)),   # stream support tiles (bf16)
                pl.BlockSpec((1, f_p), lambda i, k: (0, 0)),    # layer bias (f32)
                pl.BlockSpec((f_p, f_n), lambda i, k: (0, 0)),  # next weight / clf slab (bf16)
                pl.BlockSpec((1, f_n), lambda i, k: (0, 0)),    # next bias (f32)
            ],
            out_specs=pl.BlockSpec((tm, f_n), lambda i, k: (i, 0)),
            scratch_shapes=[pltpu.VMEM((tm, f_p), jnp.float32)],
        ),
        compiler_params=pltpu.CompilerParams(
            dimension_semantics=("parallel", "arbitrary"),
            vmem_limit_bytes=_VMEM_LIMIT),
        cost_estimate=pl.CostEstimate(
            flops=2 * n_p * n_p * f_p + 2 * n_p * f_p * f_n + 6 * n_p * f_p,
            transcendentals=n_p * f_p,
            bytes_accessed=n_p * n_p * 2 + n_p * f_p * 2 + f_p * f_n * 2
            + n_p * f_n * out_bytes),
    )(adj_b, sup, b, w_next, b_next)


# ----------------------------- model ------------------------------------------

def xavier_normal(key, fan_in, fan_out, gain):
    std = gain * math.sqrt(2.0 / (fan_in + fan_out))
    return std * jax.random.normal(key, (fan_in, fan_out), dtype=jnp.float32)


def init_params(key, in_dim, out_dim):
    """Mirrors the act_func='selu_xn' init path of the PyTorch module."""
    in_dim2 = math.isqrt(in_dim)   # int(sqrt(in_dim)) without float truncation
    keys = jax.random.split(key, 2 + len(out_dim))
    params = {
        "gc1_w": xavier_normal(keys[0], in_dim, in_dim2, 3.0 / 4.0),
        "gc1_b": jnp.zeros((in_dim2,), jnp.float32),
        "gc2_w": xavier_normal(keys[1], in_dim2, in_dim2, 3.0 / 4.0),
        "gc2_b": jnp.zeros((in_dim2,), jnp.float32),
        "clf": [],
    }
    for i, num_class in enumerate(out_dim):
        # nn.Linear(in_dim2, num_class): store transposed [in_dim2, num_class]
        w = xavier_normal(keys[2 + i], in_dim2, num_class, 1.0)
        params["clf"].append((w, jnp.zeros((num_class,), jnp.float32)))
    return params


def gcn_forward(params, x, adj):
    n, in_dim = x.shape
    f = params["gc1_w"].shape[1]           # in_dim2
    assert f <= LANE, "feature width must fit within one lane group"
    f_p = LANE

    head_sizes = [int(w.shape[1]) for (w, _) in params["clf"]]
    total = sum(head_sizes)
    out_p = _round_up(max(total, 1), LANE)

    tm, tk = _choose_tiles(n, f_p, max(f_p, out_p), _TILE_BUDGET)
    n_p = _round_up(max(n, 1), max(tm, tk))
    tm_proj = _choose_tm_proj(n_p, in_dim, f_p, _TILE_BUDGET)

    bf = jnp.bfloat16
    # ---- zero-pad operands; everything the MXU touches is kept in bf16 ----
    x_b = _pad2(x, n_p, in_dim).astype(bf)
    adj_b = _pad2(adj, n_p, n_p).astype(bf)      # bf16 halves the N^2 HBM stream
    w1_b = _pad2(params["gc1_w"], in_dim, f_p).astype(bf)
    b1_p = _pad2(params["gc1_b"].reshape(1, -1), 1, f_p)
    w2_b = _pad2(params["gc2_w"], f_p, f_p).astype(bf)
    b2_p = _pad2(params["gc2_b"].reshape(1, -1), 1, f_p)
    wc = jnp.concatenate([w for (w, _) in params["clf"]], axis=1)
    bc = jnp.concatenate([b for (_, b) in params["clf"]], axis=0)
    wc_b = _pad2(wc, f_p, out_p).astype(bf)
    bc_p = _pad2(bc.reshape(1, -1), 1, out_p)
    zero_b = jnp.zeros((1, f_p), jnp.float32)

    # ---- 3 fused / tiled pallas_calls ----
    sup1 = _proj_call(x_b, w1_b, tm_proj)                         # x @ W1 (bf16)
    sup2 = _gcn_fused_call(adj_b, sup1, b1_p, w2_b, zero_b,       # gc1 + proj into W2
                           tm, tk, out_dtype=bf)
    logits = _gcn_fused_call(adj_b, sup2, b2_p, wc_b, bc_p,       # gc2 + all clf heads
                             tm, tk, out_dtype=jnp.float32)

    outs, off = [], 0
    for sz in head_sizes:
        outs.append(logits[:n, off:off + sz])
        off += sz
    return outs


# ----------------------------- references (plain JAX) -------------------------

def _matched_ref(params, x, adj):
    """Precision-matched reference: mirrors the kernel's bf16 MXU paths exactly."""
    bf, f32 = jnp.bfloat16, jnp.float32
    adj_b = adj.astype(bf)
    sup1 = jnp.dot(x.astype(bf), params["gc1_w"].astype(bf),
                   preferred_element_type=f32).astype(bf)
    h1 = _selu(jnp.dot(adj_b, sup1, preferred_element_type=f32)) + params["gc1_b"]
    sup2 = jnp.dot(h1.astype(bf), params["gc2_w"].astype(bf),
                   preferred_element_type=f32).astype(bf)
    h2 = _selu(jnp.dot(adj_b, sup2, preferred_element_type=f32)) + params["gc2_b"]
    h2_b = h2.astype(bf)
    return [jnp.dot(h2_b, w.astype(bf), preferred_element_type=f32) + b
            for (w, b) in params["clf"]]


def _f32_ref(params, x, adj):
    """Full-f32 reference (module semantics, no quantization)."""
    hp = jax.lax.Precision.HIGHEST
    h = _selu(jnp.matmul(adj, jnp.matmul(x, params["gc1_w"], precision=hp),
                         precision=hp)) + params["gc1_b"]
    h = _selu(jnp.matmul(adj, jnp.matmul(h, params["gc2_w"], precision=hp),
                         precision=hp)) + params["gc2_b"]
    return [jnp.matmul(h, w, precision=hp) + b for (w, b) in params["clf"]]


# ----------------------------- main -------------------------------------------

if __name__ == "__main__":
    in_dim = 64              # -> in_dim2 = 8
    out_dim = [3, 5]         # two classifier heads
    n_nodes = 320            # exercises padding (320 -> 512) and a multi-step grid

    key = jax.random.PRNGKey(0)
    k_param, k_x, k_adj, k_b1, k_b2, k_bc = jax.random.split(key, 6)

    params = init_params(k_param, in_dim, out_dim)
    # non-zero biases so the bias-after-activation path is actually exercised
    in_dim2 = params["gc1_w"].shape[1]
    params["gc1_b"] = 0.05 * jax.random.normal(k_b1, (in_dim2,), jnp.float32)
    params["gc2_b"] = 0.05 * jax.random.normal(k_b2, (in_dim2,), jnp.float32)
    bkeys = jax.random.split(k_bc, len(out_dim))
    params["clf"] = [
        (w, 0.05 * jax.random.normal(bk, (w.shape[1],), jnp.float32))
        for (w, _), bk in zip(params["clf"], bkeys)
    ]

    x = jax.random.normal(k_x, (n_nodes, in_dim), dtype=jnp.float32)
    # symmetric row-normalized dense adjacency (stand-in for the sparse adj)
    a = jax.random.uniform(k_adj, (n_nodes, n_nodes), dtype=jnp.float32)
    a = (a + a.T) * 0.5 + jnp.eye(n_nodes, dtype=jnp.float32)
    adj = a / jnp.sum(a, axis=1, keepdims=True)

    fwd = jax.jit(lambda p, xx, aa: gcn_forward(p, xx, aa))
    outs = fwd(params, x, adj)
    outs = [jax.block_until_ready(o) for o in outs]

    matched = _matched_ref(params, x, adj)
    exact = _f32_ref(params, x, adj)
    for o, m, e, nc in zip(outs, matched, exact, out_dim):
        assert o.shape == (n_nodes, nc), (o.shape, nc)
        # tight check against the precision-matched (bf16-MXU) reference
        assert jnp.allclose(o, m, atol=5e-3, rtol=5e-3), \
            float(jnp.max(jnp.abs(o - m)))
        # looser sanity check against the full-f32 reference
        assert jnp.allclose(o, e, atol=5e-2, rtol=5e-2), \
            float(jnp.max(jnp.abs(o - e)))

    print("KERNEL_OK")
</pallas_src>

<mosaic_0001>
module attributes {stable_mosaic.version = 11 : i64} {
  func.func @_proj_kernel(%arg0: i32, %arg1: memref<256x64xbf16, #tpu.memory_space<vmem>>, %arg2: memref<64x128xbf16, #tpu.memory_space<vmem>>, %arg3: memref<256x128xbf16, #tpu.memory_space<vmem>>) attributes {dimension_semantics = [#tpu.dimension_semantics<parallel>], iteration_bounds = array<i64: 2>, scalar_prefetch = 0 : i64, scratch_operands = 0 : i64, tpu.core_type = #tpu.core_type<tc>, window_params = [{transform_indices = @transform_0, window_bounds = array<i64: 256, 64>}, {pipeline_mode = #tpu.pipeline_mode<synchronous>, transform_indices = @transform_1, window_bounds = array<i64: 64, 128>}, {transform_indices = @transform_2, window_bounds = array<i64: 256, 128>}]} {
    %c0 = arith.constant 0 : index
    %c0_0 = arith.constant 0 : index
    %0 = vector.load %arg1[%c0, %c0_0] : memref<256x64xbf16, #tpu.memory_space<vmem>>, vector<256x64xbf16>
    %c0_1 = arith.constant 0 : index
    %c0_2 = arith.constant 0 : index
    %1 = vector.load %arg2[%c0_1, %c0_2] : memref<64x128xbf16, #tpu.memory_space<vmem>>, vector<64x128xbf16>
    %cst = arith.constant dense<0.000000e+00> : vector<256x128xf32>
    %2 = tpu.matmul %0, %1, %cst {dimension_numbers = #tpu.dot_dimension_numbers<[1], [0], [0], [1], [0, 0, 1, 1], [], []>} : vector<256x64xbf16>, vector<64x128xbf16>, vector<256x128xf32> -> vector<256x128xf32>
    %3 = arith.truncf %2 : vector<256x128xf32> to vector<256x128xbf16>
    %c0_3 = arith.constant 0 : index
    %c0_4 = arith.constant 0 : index
    %4 = vector.load %arg3[%c0_3, %c0_4] : memref<256x128xbf16, #tpu.memory_space<vmem>>, vector<256x128xbf16>
    tpu.vector_store %arg3[%c0_3, %c0_4], %3 {strides = array<i32>} : memref<256x128xbf16, #tpu.memory_space<vmem>>, vector<256x128xbf16>,
    return
  }
  func.func @transform_0(%arg0: i32) -> (i32, i32) {
    %c0_i32 = arith.constant 0 : i32
    %c0_i32_0 = arith.constant 0 : i32
    return %arg0, %c0_i32 : i32, i32
  }
  func.func @transform_1(%arg0: i32) -> (i32, i32) {
    %c0_i32 = arith.constant 0 : i32
    %c0_i32_0 = arith.constant 0 : i32
    %c0_i32_1 = arith.constant 0 : i32
    return %c0_i32, %c0_i32_0 : i32, i32
  }
  func.func @transform_2(%arg0: i32) -> (i32, i32) {
    %c0_i32 = arith.constant 0 : i32
    %c0_i32_0 = arith.constant 0 : i32
    return %arg0, %c0_i32 : i32, i32
  }
}

module attributes {stable_mosaic.version = 11 : i64} {
  func.func @_gcn_fused_kernel(%arg0: i32, %arg1: i32, %arg2: memref<128x256xbf16, #tpu.memory_space<vmem>>, %arg3: memref<256x128xbf16, #tpu.memory_space<vmem>>, %arg4: memref<1x128xf32, #tpu.memory_space<vmem>>, %arg5: memref<128x128xbf16, #tpu.memory_space<vmem>>, %arg6: memref<1x128xf32, #tpu.memory_space<vmem>>, %arg7: memref<128x128xbf16, #tpu.memory_space<vmem>>, %arg8: memref<128x128xf32, #tpu.memory_space<vmem>>) attributes {dimension_semantics = [#tpu.dimension_semantics<parallel>, #tpu.dimension_semantics<arbitrary>], iteration_bounds = array<i64: 4, 2>, scalar_prefetch = 0 : i64, scratch_operands = 1 : i64, tpu.core_type = #tpu.core_type<tc>, window_params = [{transform_indices = @transform_0, window_bounds = array<i64: 128, 256>}, {transform_indices = @transform_1, window_bounds = array<i64: 256, 128>}, {pipeline_mode = #tpu.pipeline_mode<synchronous>, transform_indices = @transform_2, window_bounds = array<i64: 1, 128>}, {pipeline_mode = #tpu.pipeline_mode<synchronous>, transform_indices = @transform_3, window_bounds = array<i64: 128, 128>}, {pipeline_mode = #tpu.pipeline_mode<synchronous>, transform_indices = @transform_4, window_bounds = array<i64: 1, 128>}, {transform_indices = @transform_5, window_bounds = array<i64: 128, 128>}]} {
    %c0_i32 = arith.constant 0 : i32
    %0 = arith.cmpi eq, %arg1, %c0_i32 : i32
    %1 = arith.extui %0 : i1 to i32
    %c0_i32_0 = arith.constant 0 : i32
    %2 = arith.cmpi ne, %1, %c0_i32_0 : i32
    scf.if %2 {
      %cst_9 = arith.constant 0.000000e+00 : f32
      %12 = vector.broadcast %cst_9 : f32 to vector<128x128xf32>
      %c0_10 = arith.constant 0 : index
      %c0_11 = arith.constant 0 : index
      %13 = vector.load %arg8[%c0_10, %c0_11] : memref<128x128xf32, #tpu.memory_space<vmem>>, vector<128x128xf32>
      tpu.vector_store %arg8[%c0_10, %c0_11], %12 {strides = array<i32>} : memref<128x128xf32, #tpu.memory_space<vmem>>, vector<128x128xf32>,
    } else {
    }
    %c0 = arith.constant 0 : index
    %c0_1 = arith.constant 0 : index
    %3 = vector.load %arg8[%c0, %c0_1] : memref<128x128xf32, #tpu.memory_space<vmem>>, vector<128x128xf32>
    %c0_2 = arith.constant 0 : index
    %c0_3 = arith.constant 0 : index
    %4 = vector.load %arg2[%c0_2, %c0_3] : memref<128x256xbf16, #tpu.memory_space<vmem>>, vector<128x256xbf16>
    %c0_4 = arith.constant 0 : index
    %c0_5 = arith.constant 0 : index
    %5 = vector.load %arg3[%c0_4, %c0_5] : memref<256x128xbf16, #tpu.memory_space<vmem>>, vector<256x128xbf16>
    %cst = arith.constant dense<0.000000e+00> : vector<128x128xf32>
    %6 = tpu.matmul %4, %5, %cst {dimension_numbers = #tpu.dot_dimension_numbers<[1], [0], [0], [1], [0, 0, 1, 1], [], []>} : vector<128x256xbf16>, vector<256x128xbf16>, vector<128x128xf32> -> vector<128x128xf32>
    %7 = arith.addf %3, %6 : vector<128x128xf32>
    %c0_6 = arith.constant 0 : index
    %c0_7 = arith.constant 0 : index
    %8 = vector.load %arg8[%c0_6, %c0_7] : memref<128x128xf32, #tpu.memory_space<vmem>>, vector<128x128xf32>
    tpu.vector_store %arg8[%c0_6, %c0_7], %7 {strides = array<i32>} : memref<128x128xf32, #tpu.memory_space<vmem>>, vector<128x128xf32>,
    %c1_i32 = arith.constant 1 : i32
    %9 = arith.cmpi eq, %arg1, %c1_i32 : i32
    %10 = arith.extui %9 : i1 to i32
    %c0_i32_8 = arith.constant 0 : i32
    %11 = arith.cmpi ne, %10, %c0_i32_8 : i32
    scf.if %11 {
      %c0_9 = arith.constant 0 : index
      %c0_10 = arith.constant 0 : index
      %12 = vector.load %arg8[%c0_9, %c0_10] : memref<128x128xf32, #tpu.memory_space<vmem>>, vector<128x128xf32>
      %cst_11 = arith.constant 0.000000e+00 : f32
      %13 = vector.broadcast %cst_11 : f32 to vector<128x128xf32>
      %14 = arith.minimumf %12, %13 : vector<128x128xf32>
      %15 = math.exp %14 : vector<128x128xf32>
      %cst_12 = arith.constant 1.000000e+00 : f32
      %16 = vector.broadcast %cst_12 : f32 to vector<128x128xf32>
      %17 = arith.subf %15, %16 : vector<128x128xf32>
      %cst_13 = arith.constant 1.67326319 : f32
      %18 = vector.broadcast %cst_13 : f32 to vector<128x128xf32>
      %19 = arith.mulf %18, %17 : vector<128x128xf32>
      %cst_14 = arith.constant 0.000000e+00 : f32
      %20 = vector.broadcast %cst_14 : f32 to vector<128x128xf32>
      %21 = arith.cmpf ogt, %12, %20 : vector<128x128xf32>
      %22 = arith.select %21, %12, %19 : vector<128x128xi1>, vector<128x128xf32>
      %cst_15 = arith.constant 1.05070102 : f32
      %23 = vector.broadcast %cst_15 : f32 to vector<128x128xf32>
      %24 = arith.mulf %23, %22 : vector<128x128xf32>
      %c0_16 = arith.constant 0 : index
      %c0_17 = arith.constant 0 : index
      %25 = vector.load %arg4[%c0_16, %c0_17] : memref<1x128xf32, #tpu.memory_space<vmem>>, vector<1x128xf32>
      %26 = vector.broadcast %25 : vector<1x128xf32> to vector<128x128xf32>
      %27 = arith.addf %24, %26 : vector<128x128xf32>
      %28 = arith.truncf %27 : vector<128x128xf32> to vector<128x128xbf16>
      %c0_18 = arith.constant 0 : index
      %c0_19 = arith.constant 0 : index
      %29 = vector.load %arg5[%c0_18, %c0_19] : memref<128x128xbf16, #tpu.memory_space<vmem>>, vector<128x128xbf16>
      %cst_20 = arith.constant dense<0.000000e+00> : vector<128x128xf32>
      %30 = tpu.matmul %28, %29, %cst_20 {dimension_numbers = #tpu.dot_dimension_numbers<[1], [0], [0], [1], [0, 0, 1, 1], [], []>} : vector<128x128xbf16>, vector<128x128xbf16>, vector<128x128xf32> -> vector<128x128xf32>
      %c0_21 = arith.constant 0 : index
      %c0_22 = arith.constant 0 : index
      %31 = vector.load %arg6[%c0_21, %c0_22] : memref<1x128xf32, #tpu.memory_space<vmem>>, vector<1x128xf32>
      %32 = vector.broadcast %31 : vector<1x128xf32> to vector<128x128xf32>
      %33 = arith.addf %30, %32 : vector<128x128xf32>
      %34 = arith.truncf %33 : vector<128x128xf32> to vector<128x128xbf16>
      %c0_23 = arith.constant 0 : index
      %c0_24 = arith.constant 0 : index
      %35 = vector.load %arg7[%c0_23, %c0_24] : memref<128x128xbf16, #tpu.memory_space<vmem>>, vector<128x128xbf16>
      tpu.vector_store %arg7[%c0_23, %c0_24], %34 {strides = array<i32>} : memref<128x128xbf16, #tpu.memory_space<vmem>>, vector<128x128xbf16>,
    } else {
    }
    return
  }
  func.func @transform_0(%arg0: i32, %arg1: i32) -> (i32, i32) {
    %c0_i32 = arith.constant 0 : i32
    return %arg0, %arg1 : i32, i32
  }
  func.func @transform_1(%arg0: i32, %arg1: i32) -> (i32, i32) {
    %c0_i32 = arith.constant 0 : i32
    %c0_i32_0 = arith.constant 0 : i32
    return %arg1, %c0_i32 : i32, i32
  }
  func.func @transform_2(%arg0: i32, %arg1: i32) -> (i32, i32) {
    %c0_i32 = arith.constant 0 : i32
    %c0_i32_0 = arith.constant 0 : i32
    %c0_i32_1 = arith.constant 0 : i32
    return %c0_i32, %c0_i32_0 : i32, i32
  }
  func.func @transform_3(%arg0: i32, %arg1: i32) -> (i32, i32) {
    %c0_i32 = arith.constant 0 : i32
    %c0_i32_0 = arith.constant 0 : i32
    %c0_i32_1 = arith.constant 0 : i32
    return %c0_i32, %c0_i32_0 : i32, i32
  }
  func.func @transform_4(%arg0: i32, %arg1: i32) -> (i32, i32) {
    %c0_i32 = arith.constant 0 : i32
    %c0_i32_0 = arith.constant 0 : i32
    %c0_i32_1 = arith.constant 0 : i32
    return %c0_i32, %c0_i32_0 : i32, i32
  }
  func.func @transform_5(%arg0: i32, %arg1: i32) -> (i32, i32) {
    %c0_i32 = arith.constant 0 : i32
    %c0_i32_0 = arith.constant 0 : i32
    return %arg0, %c0_i32 : i32, i32
  }
}

module attributes {stable_mosaic.version = 11 : i64} {
  func.func @_gcn_fused_kernel(%arg0: i32, %arg1: i32, %arg2: memref<128x256xbf16, #tpu.memory_space<vmem>>, %arg3: memref<256x128xbf16, #tpu.memory_space<vmem>>, %arg4: memref<1x128xf32, #tpu.memory_space<vmem>>, %arg5: memref<128x128xbf16, #tpu.memory_space<vmem>>, %arg6: memref<1x128xf32, #tpu.memory_space<vmem>>, %arg7: memref<128x128xf32, #tpu.memory_space<vmem>>, %arg8: memref<128x128xf32, #tpu.memory_space<vmem>>) attributes {dimension_semantics = [#tpu.dimension_semantics<parallel>, #tpu.dimension_semantics<arbitrary>], iteration_bounds = array<i64: 4, 2>, scalar_prefetch = 0 : i64, scratch_operands = 1 : i64, tpu.core_type = #tpu.core_type<tc>, window_params = [{transform_indices = @transform_0, window_bounds = array<i64: 128, 256>}, {transform_indices = @transform_1, window_bounds = array<i64: 256, 128>}, {pipeline_mode = #tpu.pipeline_mode<synchronous>, transform_indices = @transform_2, window_bounds = array<i64: 1, 128>}, {pipeline_mode = #tpu.pipeline_mode<synchronous>, transform_indices = @transform_3, window_bounds = array<i64: 128, 128>}, {pipeline_mode = #tpu.pipeline_mode<synchronous>, transform_indices = @transform_4, window_bounds = array<i64: 1, 128>}, {transform_indices = @transform_5, window_bounds = array<i64: 128, 128>}]} {
    %c0_i32 = arith.constant 0 : i32
    %0 = arith.cmpi eq, %arg1, %c0_i32 : i32
    %1 = arith.extui %0 : i1 to i32
    %c0_i32_0 = arith.constant 0 : i32
    %2 = arith.cmpi ne, %1, %c0_i32_0 : i32
    scf.if %2 {
      %cst_9 = arith.constant 0.000000e+00 : f32
      %12 = vector.broadcast %cst_9 : f32 to vector<128x128xf32>
      %c0_10 = arith.constant 0 : index
      %c0_11 = arith.constant 0 : index
      %13 = vector.load %arg8[%c0_10, %c0_11] : memref<128x128xf32, #tpu.memory_space<vmem>>, vector<128x128xf32>
      tpu.vector_store %arg8[%c0_10, %c0_11], %12 {strides = array<i32>} : memref<128x128xf32, #tpu.memory_space<vmem>>, vector<128x128xf32>,
    } else {
    }
    %c0 = arith.constant 0 : index
    %c0_1 = arith.constant 0 : index
    %3 = vector.load %arg8[%c0, %c0_1] : memref<128x128xf32, #tpu.memory_space<vmem>>, vector<128x128xf32>
    %c0_2 = arith.constant 0 : index
    %c0_3 = arith.constant 0 : index
    %4 = vector.load %arg2[%c0_2, %c0_3] : memref<128x256xbf16, #tpu.memory_space<vmem>>, vector<128x256xbf16>
    %c0_4 = arith.constant 0 : index
    %c0_5 = arith.constant 0 : index
    %5 = vector.load %arg3[%c0_4, %c0_5] : memref<256x128xbf16, #tpu.memory_space<vmem>>, vector<256x128xbf16>
    %cst = arith.constant dense<0.000000e+00> : vector<128x128xf32>
    %6 = tpu.matmul %4, %5, %cst {dimension_numbers = #tpu.dot_dimension_numbers<[1], [0], [0], [1], [0, 0, 1, 1], [], []>} : vector<128x256xbf16>, vector<256x128xbf16>, vector<128x128xf32> -> vector<128x128xf32>
    %7 = arith.addf %3, %6 : vector<128x128xf32>
    %c0_6 = arith.constant 0 : index
    %c0_7 = arith.constant 0 : index
    %8 = vector.load %arg8[%c0_6, %c0_7] : memref<128x128xf32, #tpu.memory_space<vmem>>, vector<128x128xf32>
    tpu.vector_store %arg8[%c0_6, %c0_7], %7 {strides = array<i32>} : memref<128x128xf32, #tpu.memory_space<vmem>>, vector<128x128xf32>,
    %c1_i32 = arith.constant 1 : i32
    %9 = arith.cmpi eq, %arg1, %c1_i32 : i32
    %10 = arith.extui %9 : i1 to i32
    %c0_i32_8 = arith.constant 0 : i32
    %11 = arith.cmpi ne, %10, %c0_i32_8 : i32
    scf.if %11 {
      %c0_9 = arith.constant 0 : index
      %c0_10 = arith.constant 0 : index
      %12 = vector.load %arg8[%c0_9, %c0_10] : memref<128x128xf32, #tpu.memory_space<vmem>>, vector<128x128xf32>
      %cst_11 = arith.constant 0.000000e+00 : f32
      %13 = vector.broadcast %cst_11 : f32 to vector<128x128xf32>
      %14 = arith.minimumf %12, %13 : vector<128x128xf32>
      %15 = math.exp %14 : vector<128x128xf32>
      %cst_12 = arith.constant 1.000000e+00 : f32
      %16 = vector.broadcast %cst_12 : f32 to vector<128x128xf32>
      %17 = arith.subf %15, %16 : vector<128x128xf32>
      %cst_13 = arith.constant 1.67326319 : f32
      %18 = vector.broadcast %cst_13 : f32 to vector<128x128xf32>
      %19 = arith.mulf %18, %17 : vector<128x128xf32>
      %cst_14 = arith.constant 0.000000e+00 : f32
      %20 = vector.broadcast %cst_14 : f32 to vector<128x128xf32>
      %21 = arith.cmpf ogt, %12, %20 : vector<128x128xf32>
      %22 = arith.select %21, %12, %19 : vector<128x128xi1>, vector<128x128xf32>
      %cst_15 = arith.constant 1.05070102 : f32
      %23 = vector.broadcast %cst_15 : f32 to vector<128x128xf32>
      %24 = arith.mulf %23, %22 : vector<128x128xf32>
      %c0_16 = arith.constant 0 : index
      %c0_17 = arith.constant 0 : index
      %25 = vector.load %arg4[%c0_16, %c0_17] : memref<1x128xf32, #tpu.memory_space<vmem>>, vector<1x128xf32>
      %26 = vector.broadcast %25 : vector<1x128xf32> to vector<128x128xf32>
      %27 = arith.addf %24, %26 : vector<128x128xf32>
      %28 = arith.truncf %27 : vector<128x128xf32> to vector<128x128xbf16>
      %c0_18 = arith.constant 0 : index
      %c0_19 = arith.constant 0 : index
      %29 = vector.load %arg5[%c0_18, %c0_19] : memref<128x128xbf16, #tpu.memory_space<vmem>>, vector<128x128xbf16>
      %cst_20 = arith.constant dense<0.000000e+00> : vector<128x128xf32>
      %30 = tpu.matmul %28, %29, %cst_20 {dimension_numbers = #tpu.dot_dimension_numbers<[1], [0], [0], [1], [0, 0, 1, 1], [], []>} : vector<128x128xbf16>, vector<128x128xbf16>, vector<128x128xf32> -> vector<128x128xf32>
      %c0_21 = arith.constant 0 : index
      %c0_22 = arith.constant 0 : index
      %31 = vector.load %arg6[%c0_21, %c0_22] : memref<1x128xf32, #tpu.memory_space<vmem>>, vector<1x128xf32>
      %32 = vector.broadcast %31 : vector<1x128xf32> to vector<128x128xf32>
      %33 = arith.addf %30, %32 : vector<128x128xf32>
      %c0_23 = arith.constant 0 : index
      %c0_24 = arith.constant 0 : index
      %34 = vector.load %arg7[%c0_23, %c0_24] : memref<128x128xf32, #tpu.memory_space<vmem>>, vector<128x128xf32>
      tpu.vector_store %arg7[%c0_23, %c0_24], %33 {strides = array<i32>} : memref<128x128xf32, #tpu.memory_space<vmem>>, vector<128x128xf32>,
    } else {
    }
    return
  }
  func.func @transform_0(%arg0: i32, %arg1: i32) -> (i32, i32) {
    %c0_i32 = arith.constant 0 : i32
    return %arg0, %arg1 : i32, i32
  }
  func.func @transform_1(%arg0: i32, %arg1: i32) -> (i32, i32) {
    %c0_i32 = arith.constant 0 : i32
    %c0_i32_0 = arith.constant 0 : i32
    return %arg1, %c0_i32 : i32, i32
  }
  func.func @transform_2(%arg0: i32, %arg1: i32) -> (i32, i32) {
    %c0_i32 = arith.constant 0 : i32
    %c0_i32_0 = arith.constant 0 : i32
    %c0_i32_1 = arith.constant 0 : i32
    return %c0_i32, %c0_i32_0 : i32, i32
  }
  func.func @transform_3(%arg0: i32, %arg1: i32) -> (i32, i32) {
    %c0_i32 = arith.constant 0 : i32
    %c0_i32_0 = arith.constant 0 : i32
    %c0_i32_1 = arith.constant 0 : i32
    return %c0_i32, %c0_i32_0 : i32, i32
  }
  func.func @transform_4(%arg0: i32, %arg1: i32) -> (i32, i32) {
    %c0_i32 = arith.constant 0 : i32
    %c0_i32_0 = arith.constant 0 : i32
    %c0_i32_1 = arith.constant 0 : i32
    return %c0_i32, %c0_i32_0 : i32, i32
  }
  func.func @transform_5(%arg0: i32, %arg1: i32) -> (i32, i32) {
    %c0_i32 = arith.constant 0 : i32
    %c0_i32_0 = arith.constant 0 : i32
    return %arg0, %c0_i32 : i32, i32
  }
}

</mosaic_0001>

<bundles_post_ra>
// kernel: _lambda_.3
= control target key start
LH: loop header
LB: loop body
LE: loop exit
PB: predicated region body
PF: predicated region fallthrough
CT: control target
= control target key end

     0   :  { %s1043_s9 = smov 0   ;;  %s1131_s0 = inlined_call_operand.vmem [shape: bf16[512,64], index: 0, kind: input, shape index: {}]   ;;  %s1132_s1 = inlined_call_operand.vmem [shape: bf16[64,128], index: 1, kind: input, shape index: {}]   ;;  %s1133_s2 = inlined_call_operand.vmem [shape: bf16[512,128], index: 2, kind: output, shape index: {}]  }
   0x1 LB: > { %s718_s10 = sadd.s32 4294967295, %s1026_s9   ;;  %p722_p0 = scmp.ge.s32.totalorder %s1026_s9, 1  ;;  %s1026_s9 = sphi %s1043_s9, %s12_s9  }
   0x2   : > { %p113_p1 = scmp.lt.s32.totalorder %s1026_s9, 3 }
   0x4   : > { %p114_p2 = pnand %p722_p0, %p113_p1 }
   0x5   : > { %v1000_v0 = vld [vmem:[%s1132_s1] sm:$0xff] (!%p114_p2)   ;;  %s723_s13 = sshll.u32 (!%p114_p2), %s718_s10, 5  ;;  %v1001_v1 = vld [vmem:[%s1132_s1 + $0x8] sm:$0xff] (!%p114_p2)   ;;  %v1002_v2 = vld [vmem:[%s1132_s1 + $0x10] sm:$0xff] (!%p114_p2)   ;;  %vm292_vm0 = vcmask (!%p114_p2), 523264  }
   0x6   : > { %117 = sbr.rel (%p114_p2) target bundleno = 264 (0x108), region = 28  ;;  %p136_p3 = scmp.lt.s32.totalorder (!%p114_p2), %s723_s13, 63  ;;  %944 = vmatprep.subr.bf16.mxu0 (!%p114_p2), %v1000_v0  ;;  %984 = vmatprep.subr.bf16.mxu1 (!%p114_p2), %v1000_v0  ;;  %v1003_v3 = vld [vmem:[%s1132_s1 + $0x18] sm:$0xff] (!%p114_p2)  }
   0x7   : > { %945 = vmatpush3.bf16.msra.mxu0 (!%p114_p2), %v1000_v0  ;;  %988 = vmatpush3.bf16.msra.mxu1 (!%p114_p2), %v1000_v0 }
   0x8   : > { %946 = vmatprep.subr.bf16.mxu0 (!%p114_p2), %v1001_v1  ;;  %985 = vmatprep.subr.bf16.mxu1 (!%p114_p2), %v1001_v1 }
   0xb   : > { %947 = vmatpush3.bf16.msra.mxu0 (!%p114_p2), %v1001_v1  ;;  %989 = vmatpush3.bf16.msra.mxu1 (!%p114_p2), %v1001_v1 }
   0xc   : > { %948 = vmatprep.subr.bf16.mxu0 (!%p114_p2), %v1002_v2  ;;  %986 = vmatprep.subr.bf16.mxu1 (!%p114_p2), %v1002_v2 }
   0xd   : > { %s1135_s13 = smov (!%p136_p3, %s723_s13), 63 }
   0xe   : > { %s724_s18 = sshll.u32 %s1135_s13, 2 }
   0xf   : > { %s1071_s23 = scalar_lea.vmem %s1131_s0, %s724_s18  ;;  %949 = vmatpush3.bf16.msra.mxu0 %v1002_v2  ;;  %990 = vmatpush3.bf16.msra.mxu1 %v1002_v2  ;;  %s1110_s26 = scalar_lea.vmem %s1133_s2, %s724_s18 }
  0x10   : > { %v1004_v4 = vld [vmem:[%s1071_s23] sm:$0xff]   ;;  %950 = vmatprep.subr.bf16.mxu0 %v1003_v3  ;;  %987 = vmatprep.subr.bf16.mxu1 %v1003_v3  ;;  %v1006_v6 = vld [vmem:[%s1071_s23 + $0x8] sm:$0xff]   ;;  %v1008_v8 = vld [vmem:[%s1071_s23 + $0x10] sm:$0xff]  }
  0x11   : > { %v1005_v5 = vld [vmem:[%s1071_s23 + $0x40] sm:$0xff]   ;;  %952 = vmatprep.mubr.msk.bf16.mxu0 %vm292_vm0, %v1004_v4  ;;  %v1007_v7 = vld [vmem:[%s1071_s23 + $0x48] sm:$0xff]   ;;  %v1009_v9 = vld [vmem:[%s1071_s23 + $0x50] sm:$0xff]  }
  0x12   : > { %968 = vmatprep.mubr.msk.bf16.mxu1 %vm292_vm0, %v1005_v5  ;;  %v1010_v10 = vld [vmem:[%s1071_s23 + $0x18] sm:$0xff]   ;;  %v1012_v12 = vld [vmem:[%s1071_s23 + $0x20] sm:$0xff]   ;;  %v1014_v14 = vld [vmem:[%s1071_s23 + $0x28] sm:$0xff]  }
  0x13   : > { %951 = vmatpush3.bf16.msra.mxu0 %v1003_v3  ;;  %991 = vmatpush3.bf16.msra.mxu1 %v1003_v3  ;;  %v1011_v11 = vld [vmem:[%s1071_s23 + $0x58] sm:$0xff]   ;;  %v1013_v13 = vld [vmem:[%s1071_s23 + $0x60] sm:$0xff]   ;;  %v1015_v15 = vld [vmem:[%s1071_s23 + $0x68] sm:$0xff]  }
  0x14   : > { %v1016_v16 = vld [vmem:[%s1071_s23 + $0x30] sm:$0xff]   ;;  %v1018_v18 = vld [vmem:[%s1071_s23 + $0x38] sm:$0xff]  }
  0x15   : > { %v1017_v17 = vld [vmem:[%s1071_s23 + $0x70] sm:$0xff]   ;;  %v1019_v19 = vld [vmem:[%s1071_s23 + $0x78] sm:$0xff]  }
  0x16   : > { %953 = vmatmul.mubr.msk.bf16.vlgmr.msra.gmra.mrb[0].mxu0 %vm292_vm0, %v1006_v6  ;;  %969 = vmatmul.mubr.msk.bf16.vlgmr.msra.gmra.mrb[0].mxu1 %vm292_vm0, %v1007_v7 }
  0x17   : > { %956 = vmatprep.mubr.msk.bf16.mxu0 %vm292_vm0, %v1008_v8  ;;  %972 = vmatprep.mubr.msk.bf16.mxu1 %vm292_vm0, %v1009_v9 }
  0x1e   : > { %957 = vmatmul.mubr.msk.bf16.gmra.mrb[4].mxu0 %vm292_vm0, %v1010_v10  ;;  %973 = vmatmul.mubr.msk.bf16.gmra.mrb[4].mxu1 %vm292_vm0, %v1011_v11 }
  0x1f   : > { %960 = vmatprep.mubr.msk.bf16.mxu0 %vm292_vm0, %v1012_v12  ;;  %976 = vmatprep.mubr.msk.bf16.mxu1 %vm292_vm0, %v1013_v13 }
  0x26   : > { %961 = vmatmul.mubr.msk.bf16.gmra.mrb[8].mxu0 %vm292_vm0, %v1014_v14  ;;  %977 = vmatmul.mubr.msk.bf16.gmra.mrb[8].mxu1 %vm292_vm0, %v1015_v15 }
  0x27   : > { %964 = vmatprep.mubr.msk.bf16.mxu0 %vm292_vm0, %v1016_v16  ;;  %980 = vmatprep.mubr.msk.bf16.mxu1 %vm292_vm0, %v1017_v17 }
  0x2e   : > { %965 = vmatmul.mubr.msk.bf16.gmra.mrb[12].mxu0 %vm292_vm0, %v1018_v18  ;;  %981 = vmatmul.mubr.msk.bf16.gmra.mrb[12].mxu1 %vm292_vm0, %v1019_v19 }
  0xe9   : > { %v954_v20 = vpop.f32.mrb[0].mxu0  ;;  %v970_v21 = vpop.f32.mrb[0].mxu1 }
  0xea   : > { %v375_v22 = vpop.f32.mrb[1].mxu0  ;;  %v439_v23 = vpop.f32.mrb[1].mxu1 }
  0xeb   : > { %v955_v24 = vpop.f32.mrb[2].mxu0  ;;  %v971_v25 = vpop.f32.mrb[2].mxu1 }
  0xec   : > { %v837_v26 = vpack.c.bf16 %v955_v24, %v954_v20  ;;  %v877_v27 = vpack.c.bf16 %v971_v25, %v970_v21  ;;  %v378_v28 = vpop.f32.mrb[3].mxu0  ;;  %v442_v29 = vpop.f32.mrb[3].mxu1 }
  0xed   : > { %v832_v30 = vpack.c.bf16 %v378_v28, %v375_v22  ;;  %v872_v31 = vpack.c.bf16 %v442_v29, %v439_v23 }
  0xee   : > { %909 = vst [vmem:[%s1110_s26 + $0x8] sm:$0xff] %v837_v26   ;;  %917 = vst [vmem:[%s1110_s26 + $0x48] sm:$0xff] %v877_v27  }
  0xef   : > { %833 = vst [vmem:[%s1110_s26] sm:$0xff] %v832_v30   ;;  %916 = vst [vmem:[%s1110_s26 + $0x40] sm:$0xff] %v872_v31  }
  0xf1   : > { %v958_v32 = vpop.f32.mrb[4].mxu0  ;;  %v974_v33 = vpop.f32.mrb[4].mxu1 }
  0xf2   : > { %v391_v34 = vpop.f32.mrb[5].mxu0  ;;  %v455_v35 = vpop.f32.mrb[5].mxu1 }
  0xf3   : > { %v959_v36 = vpop.f32.mrb[6].mxu0  ;;  %v975_v37 = vpop.f32.mrb[6].mxu1 }
  0xf4   : > { %v847_v38 = vpack.c.bf16 %v959_v36, %v958_v32  ;;  %v887_v39 = vpack.c.bf16 %v975_v37, %v974_v33  ;;  %v394_v40 = vpop.f32.mrb[7].mxu0  ;;  %v458_v41 = vpop.f32.mrb[7].mxu1 }
  0xf5   : > { %v842_v42 = vpack.c.bf16 %v394_v40, %v391_v34  ;;  %v882_v43 = vpack.c.bf16 %v458_v41, %v455_v35 }
  0xf6   : > { %911 = vst [vmem:[%s1110_s26 + $0x18] sm:$0xff] %v847_v38   ;;  %919 = vst [vmem:[%s1110_s26 + $0x58] sm:$0xff] %v887_v39  }
  0xf7   : > { %910 = vst [vmem:[%s1110_s26 + $0x10] sm:$0xff] %v842_v42   ;;  %918 = vst [vmem:[%s1110_s26 + $0x50] sm:$0xff] %v882_v43  }
  0xf9   : > { %v962_v44 = vpop.f32.mrb[8].mxu0  ;;  %v978_v45 = vpop.f32.mrb[8].mxu1 }
  0xfa   : > { %v407_v46 = vpop.f32.mrb[9].mxu0  ;;  %v471_v47 = vpop.f32.mrb[9].mxu1 }
  0xfb   : > { %v963_v48 = vpop.f32.mrb[10].mxu0  ;;  %v979_v49 = vpop.f32.mrb[10].mxu1 }
  0xfc   : > { %v857_v50 = vpack.c.bf16 %v963_v48, %v962_v44  ;;  %v897_v51 = vpack.c.bf16 %v979_v49, %v978_v45  ;;  %v410_v52 = vpop.f32.mrb[11].mxu0  ;;  %v474_v53 = vpop.f32.mrb[11].mxu1 }
  0xfd   : > { %v852_v54 = vpack.c.bf16 %v410_v52, %v407_v46  ;;  %v892_v55 = vpack.c.bf16 %v474_v53, %v471_v47 }
  0xfe   : > { %913 = vst [vmem:[%s1110_s26 + $0x28] sm:$0xff] %v857_v50   ;;  %921 = vst [vmem:[%s1110_s26 + $0x68] sm:$0xff] %v897_v51  }
  0xff   : > { %912 = vst [vmem:[%s1110_s26 + $0x20] sm:$0xff] %v852_v54   ;;  %920 = vst [vmem:[%s1110_s26 + $0x60] sm:$0xff] %v892_v55  }
 0x101   : > { %v966_v56 = vpop.f32.mrb[12].mxu0  ;;  %v982_v57 = vpop.f32.mrb[12].mxu1 }
 0x102   : > { %v423_v58 = vpop.f32.mrb[13].mxu0  ;;  %v487_v59 = vpop.f32.mrb[13].mxu1 }
 0x103   : > { %v967_v60 = vpop.f32.mrb[14].mxu0  ;;  %v983_v61 = vpop.f32.mrb[14].mxu1 }
 0x104   : > { %v867_v62 = vpack.c.bf16 %v967_v60, %v966_v56  ;;  %v907_v63 = vpack.c.bf16 %v983_v61, %v982_v57  ;;  %v426_v0 = vpop.f32.mrb[15].mxu0  ;;  %v490_v1 = vpop.f32.mrb[15].mxu1 }
 0x105   : > { %v862_v2 = vpack.c.bf16 %v426_v0, %v423_v58  ;;  %v902_v3 = vpack.c.bf16 %v490_v1, %v487_v59 }
 0x106   : > { %915 = vst [vmem:[%s1110_s26 + $0x38] sm:$0xff] %v867_v62   ;;  %923 = vst [vmem:[%s1110_s26 + $0x78] sm:$0xff] %v907_v63  }
 0x107   : > { %914 = vst [vmem:[%s1110_s26 + $0x30] sm:$0xff] %v862_v2   ;;  %922 = vst [vmem:[%s1110_s26 + $0x70] sm:$0xff] %v902_v3  }
 0x108 PF: > { %s12_s9 = sadd.s32 1, %s1026_s9  }
 0x109   : > { %p9_p4 = scmp.ge.s32.totalorder %s12_s9, 4  }
 0x10b   :  { %11 = sbr.rel (!%p9_p4) target bundleno = 1 (0x1), region = 58 }

// kernel: _lambda_.4
= control target key start
LH: loop header
LB: loop body
LE: loop exit
PB: predicated region body
PF: predicated region fallthrough
CT: control target
= control target key end

     0   :  { %s1793_s18 = smov 0   ;;  %s1795_s19 = smov 0   ;;  %s2109_s0 = inlined_call_operand.vmem [shape: bf16[512,512], index: 0, kind: input, shape index: {}]   ;;  %s2110_s1 = inlined_call_operand.vmem [shape: bf16[512,128], index: 1, kind: input, shape index: {}]   ;;  %s2111_s2 = inlined_call_operand.vmem [shape: f32[1,128], index: 2, kind: input, shape index: {}]   ;;  %s2112_s3 = inlined_call_operand.vmem [shape: bf16[128,128], index: 3, kind: input, shape index: {}]   ;;  %s2113_s4 = inlined_call_operand.vmem [shape: f32[1,128], index: 4, kind: input, shape index: {}]   ;;  %s2114_s5 = inlined_call_operand.vmem [shape: bf16[512,128], index: 5, kind: output, shape index: {}]  }
   0x1   :  { %s1797_s20 = smov 0   ;;  %s1799_s21 = smov 0  }
   0x2   :  { %s1801_s22 = smov 0   ;;  %s1803_s23 = smov 0  }
   0x3   :  { %s1805_s24 = smov 0  }
   0x4 LB: > { %s24_s25 = sadd.s32 1, %s1752_s22  ;;  %s27_s26 = sadd.s32 1, %s1756_s23  ;;  %s1760_s24 = sphi %s1805_s24, %s15_s24   ;;  %s1756_s23 = sphi %s1803_s23, %s2120_s23   ;;  %s1752_s22 = sphi %s1801_s22, %s2119_s22   ;;  %s1748_s21 = sphi %s1799_s21, %s2118_s21   ;;  %s1744_s20 = sphi %s1797_s20, %s2117_s20   ;;  %s1740_s19 = sphi %s1795_s19, %s2116_s19   ;;  %s1736_s18 = sphi %s1793_s18, %s2115_s18  }
   0x5   : > { %p25_p0 = scmp.ge.s32.totalorder %s24_s25, 2  ;;  %p43_p1 = scmp.ne.s32.totalorder %s1740_s19, %s1736_s18 }
   0x6   : > { %p44_p2 = scmp.eq.s32.totalorder %s1760_s24, 0  ;;  %s36_s30 = sadd.s32 1, %s1740_s19 }
   0x7   : > { %s2122_s25 = smov (%p25_p0, %s24_s25), 0  ;;  %s2124_s26 = smov (!%p25_p0, %s27_s26), %s1756_s23 }
   0x8   : > { %p45_p3 = por %p44_p2, %p43_p1  ;;  %p29_p4 = scmp.ge.s32.totalorder %s2124_s26, 4 }
   0x9   : > { %s32_s27 = ssub.s32 %s1752_s22, %s2122_s25  ;;  %p1271_p6 = scmp.ge.s32.totalorder %s1760_s24, 8 }
   0xa   : > { %s2126_s26 = smov (%p29_p4, %s2124_s26), 0 }
   0xb   : > { %s31_s28 = ssub.s32 %s1756_s23, %s2126_s26  ;;  %193 = sbr.rel (%p1271_p6) target bundleno = 33 (0x21), region = 28 }
   0xc   : > { %s33_s29 = sor.u32 %s32_s27, %s31_s28 }
   0xd   : > { %p34_p5 = scmp.eq.s32.totalorder %s33_s29, 0 }
   0xf   : > { %s1844_s6 = scalar_select %p34_p5, %s1740_s19, %s36_s30  }
  0x12   : > { %196 = sbr.rel (!%p45_p3) target bundleno = 33 (0x21), region = 32  ;;  %s198_s7 = sand.u32 (%p45_p3), 1, %s1740_s19  }
  0x13   : > { %s1274_s8 = sshll.u32 (%p45_p3), %s1752_s22, 1  ;;  %s1272_s9 = sshll.u32 (%p45_p3), %s198_s7, 7 }
  0x14   : > { %s1361_s10 = sshll.u32 (%p45_p3), %s1756_s23, 6  ;;  %s200_s16 = scalar_lea.vmem (%p45_p3), [#allocation3], %s1272_s9 }
  0x15   : > { %s204_s11 = sadd.s32 (%p45_p3), %s1361_s10, %s1274_s8 }
  0x16   : > { %s1276_s12 = sshll.u32 (%p45_p3), %s204_s11, 2 }
  0x17   : > { %s1853_s15 = scalar_lea.vmem (%p45_p3), %s2109_s0, %s1276_s12 }
  0x18   : > { %v264_v0 = vld [vmem:[%s1853_s15] sm:$0xff] (%p45_p3)  ;;  %v266_v1 = vld [vmem:[%s1853_s15 + $0x10] sm:$0xff] (%p45_p3) }
  0x19   : > { %v268_v2 = vld [vmem:[%s1853_s15 + $0x20] sm:$0xff]  ;;  %265 = vst [vmem:[%s200_s16] sm:$0xff] %v264_v0  ;;  %267 = vst [vmem:[%s200_s16 + $0x8] sm:$0xff] %v266_v1  ;;  %v270_v3 = vld [vmem:[%s1853_s15 + $0x30] sm:$0xff] }
  0x1a   : > { %269 = vst [vmem:[%s200_s16 + $0x10] sm:$0xff] %v268_v2  ;;  %v272_v4 = vld [vmem:[%s1853_s15 + $0x40] sm:$0xff]  ;;  %v274_v5 = vld [vmem:[%s1853_s15 + $0x50] sm:$0xff]  ;;  %271 = vst [vmem:[%s200_s16 + $0x18] sm:$0xff] %v270_v3 }
  0x1b   : > { %273 = vst [vmem:[%s200_s16 + $0x20] sm:$0xff] %v272_v4  ;;  %275 = vst [vmem:[%s200_s16 + $0x28] sm:$0xff] %v274_v5  ;;  %v276_v6 = vld [vmem:[%s1853_s15 + $0x60] sm:$0xff]  ;;  %v278_v7 = vld [vmem:[%s1853_s15 + $0x70] sm:$0xff] }
  0x1c   : > { %v280_v8 = vld [vmem:[%s1853_s15 + $0x80] sm:$0xff]  ;;  %277 = vst [vmem:[%s200_s16 + $0x30] sm:$0xff] %v276_v6  ;;  %279 = vst [vmem:[%s200_s16 + $0x38] sm:$0xff] %v278_v7  ;;  %v282_v9 = vld [vmem:[%s1853_s15 + $0x90] sm:$0xff] }
  0x1d   : > { %281 = vst [vmem:[%s200_s16 + $0x40] sm:$0xff] %v280_v8  ;;  %v284_v10 = vld [vmem:[%s1853_s15 + $0xa0] sm:$0xff]  ;;  %v286_v11 = vld [vmem:[%s1853_s15 + $0xb0] sm:$0xff]  ;;  %283 = vst [vmem:[%s200_s16 + $0x48] sm:$0xff] %v282_v9 }
  0x1e   : > { %285 = vst [vmem:[%s200_s16 + $0x50] sm:$0xff] %v284_v10  ;;  %287 = vst [vmem:[%s200_s16 + $0x58] sm:$0xff] %v286_v11  ;;  %v288_v12 = vld [vmem:[%s1853_s15 + $0xc0] sm:$0xff]  ;;  %v290_v13 = vld [vmem:[%s1853_s15 + $0xd0] sm:$0xff] }
  0x1f   : > { %v292_v14 = vld [vmem:[%s1853_s15 + $0xe0] sm:$0xff]  ;;  %289 = vst [vmem:[%s200_s16 + $0x60] sm:$0xff] %v288_v12  ;;  %291 = vst [vmem:[%s200_s16 + $0x68] sm:$0xff] %v290_v13  ;;  %v294_v15 = vld [vmem:[%s1853_s15 + $0xf0] sm:$0xff] }
  0x20   : > { %293 = vst [vmem:[%s200_s16 + $0x70] sm:$0xff] %v292_v14  ;;  %295 = vst [vmem:[%s200_s16 + $0x78] sm:$0xff] %v294_v15 }
  0x21 PF: > { %p1277_p7 = scmp.ge.s32.totalorder %s1760_s24, 1  ;;  %p309_p8 = scmp.lt.s32.totalorder %s1760_s24, 9 }
  0x23   : > { %p310_p9 = pnand %p1277_p7, %p309_p8 }
  0x24   : > { %s316_s17 = sand.u32 (!%p310_p9), 1, %s1736_s18   ;;  %s1279_s27 = sshll.u32 (!%p310_p9), %s1744_s20, 5 }
  0x25   : > { %313 = sbr.rel (%p310_p9) target bundleno = 586 (0x24a), region = 74  ;;  %s1278_s28 = sshll.u32 (!%p310_p9), %s316_s17, 7 }
  0x26   : > { %p351_p10 = scmp.lt.s32.totalorder (!%p310_p9), %s1279_s27, 63  ;;  %s1281_s29 = sshll.u32 (!%p310_p9), %s1748_s21, 4 }
  0x27   : > { %p357_p11 = scmp.lt.s32.totalorder (!%p310_p9), %s1281_s29, 63  ;;  %s1886_s18 = scalar_lea.vmem (!%p310_p9), [#allocation3], %s1278_s28 }
  0x28   : > { %p1283_p12 = scmp.ne.s32.totalorder (!%p310_p9), %s1744_s20, 0 }
  0x2c   : > { %s2128_s27 = smov (!%p351_p10, %s1279_s27), 63  ;;  %s2130_s29 = smov (!%p357_p11, %s1281_s29), 63 }
  0x2d   : > { %s1280_s30 = sshll.u32 %s2128_s27, 2  ;;  %s1282_s10 = sshll.u32 %s2130_s29, 2  ;;  %v1762_v16 = vmov (!%p1283_p12), 0.0  }
  0x2e   : > { %s1879_s9 = scalar_lea.vmem %s2110_s1, %s1280_s30  ;;  %s1884_s13 = scalar_lea.vmem %s2114_s5, %s1282_s10  ;;  %367 = vst [vmem:[#allocation2] sm:$0xff] (!%p1283_p12), %v1762_v16  ;;  %368 = vst [vmem:[#allocation2 + $0x8] sm:$0xff] (!%p1283_p12), %v1762_v16 }
  0x2f   : > { %366 = sbr.rel (%p1283_p12) target bundleno = 54 (0x36), region = 82  ;;  %369 = vst [vmem:[#allocation2 + $0x10] sm:$0xff] (!%p1283_p12), %v1762_v16  ;;  %370 = vst [vmem:[#allocation2 + $0x18] sm:$0xff] (!%p1283_p12), %v1762_v16 }
  0x30   : > { %371 = vst [vmem:[#allocation2 + $0x20] sm:$0xff] (!%p1283_p12), %v1762_v16  ;;  %372 = vst [vmem:[#allocation2 + $0x28] sm:$0xff] (!%p1283_p12), %v1762_v16 }
  0x31   : > { %373 = vst [vmem:[#allocation2 + $0x30] sm:$0xff] (!%p1283_p12), %v1762_v16  ;;  %374 = vst [vmem:[#allocation2 + $0x38] sm:$0xff] (!%p1283_p12), %v1762_v16 }
  0x32   : > { %375 = vst [vmem:[#allocation2 + $0x40] sm:$0xff] (!%p1283_p12), %v1762_v16  ;;  %376 = vst [vmem:[#allocation2 + $0x48] sm:$0xff] (!%p1283_p12), %v1762_v16 }
  0x33   : > { %377 = vst [vmem:[#allocation2 + $0x50] sm:$0xff] (!%p1283_p12), %v1762_v16  ;;  %378 = vst [vmem:[#allocation2 + $0x58] sm:$0xff] (!%p1283_p12), %v1762_v16 }
  0x34   : > { %379 = vst [vmem:[#allocation2 + $0x60] sm:$0xff] (!%p1283_p12), %v1762_v16  ;;  %380 = vst [vmem:[#allocation2 + $0x68] sm:$0xff] (!%p1283_p12), %v1762_v16 }
  0x35   : > { %381 = vst [vmem:[#allocation2 + $0x70] sm:$0xff] (!%p1283_p12), %v1762_v16  ;;  %382 = vst [vmem:[#allocation2 + $0x78] sm:$0xff] (!%p1283_p12), %v1762_v16 }
  0x36 PF: > { %v1626_v17 = vld [vmem:[%s1879_s9 + $0x40] sm:$0xff]   ;;  %v1628_v19 = vld [vmem:[%s1879_s9 + $0x48] sm:$0xff]   ;;  %v1630_v21 = vld [vmem:[%s1879_s9 + $0x50] sm:$0xff]   ;;  %p1316_p13 = scmp.ne.s32.totalorder %s1744_s20, 1 }
  0x37   : > { %v1627_v18 = vld [vmem:[%s1879_s9] sm:$0xff]   ;;  %1425 = vmatprep.subr.bf16.mxu0 %v1626_v17  ;;  %1537 = vmatprep.subr.bf16.mxu1 %v1626_v17  ;;  %v1629_v20 = vld [vmem:[%s1879_s9 + $0x8] sm:$0xff]   ;;  %v1631_v22 = vld [vmem:[%s1879_s9 + $0x10] sm:$0xff]  }
  0x38   : > { %1426 = vmatpush3.bf16.msra.mxu0 %v1627_v18  ;;  %1545 = vmatpush3.bf16.msra.mxu1 %v1627_v18  ;;  %v1632_v23 = vld [vmem:[%s1879_s9 + $0x58] sm:$0xff]   ;;  %v1634_v25 = vld [vmem:[%s1879_s9 + $0x60] sm:$0xff]   ;;  %v1636_v27 = vld [vmem:[%s1879_s9 + $0x68] sm:$0xff]  }
  0x39   : > { %1427 = vmatprep.subr.bf16.mxu0 %v1628_v19  ;;  %1538 = vmatprep.subr.bf16.mxu1 %v1628_v19  ;;  %v1633_v24 = vld [vmem:[%s1879_s9 + $0x18] sm:$0xff]   ;;  %v1635_v26 = vld [vmem:[%s1879_s9 + $0x20] sm:$0xff]   ;;  %v1637_v30 = vld [vmem:[%s1879_s9 + $0x28] sm:$0xff]  }
  0x3a   : > { %v1644_v28 = vld [vmem:[%s1886_s18 + $0x4] ss:$8 sps:$4 sm:$0xff]   ;;  %v1638_v31 = vld [vmem:[%s1879_s9 + $0x70] sm:$0xff]   ;;  %v1640_v33 = vld [vmem:[%s1879_s9 + $0x78] sm:$0xff]  }
  0x3b   : > { %v1647_v29 = vld [vmem:[%s1886_s18 + $0x44] ss:$8 sps:$4 sm:$0xff]   ;;  %655 = vmatprep.mubr.bf16.mxu0 %v1644_v28  ;;  %v1639_v32 = vld [vmem:[%s1879_s9 + $0x30] sm:$0xff]   ;;  %v1641_v34 = vld [vmem:[%s1879_s9 + $0x38] sm:$0xff]  }
  0x3c   : > { %1428 = vmatpush3.bf16.msra.mxu0 %v1629_v20  ;;  %1546 = vmatpush3.bf16.msra.mxu1 %v1629_v20  ;;  %v1642_v35 = vld [vmem:[%s1886_s18] ss:$8 sps:$4 sm:$0xff]   ;;  %v1648_v37 = vld [vmem:[%s1886_s18 + $0x14] ss:$8 sps:$4 sm:$0xff]   ;;  %v1652_v39 = vld [vmem:[%s1886_s18 + $0x10] ss:$8 sps:$4 sm:$0xff]  }
  0x3d   : > { %1429 = vmatprep.subr.bf16.mxu0 %v1630_v21  ;;  %1539 = vmatprep.subr.bf16.mxu1 %v1630_v21  ;;  %v1645_v36 = vld [vmem:[%s1886_s18 + $0x40] ss:$8 sps:$4 sm:$0xff]   ;;  %v1650_v38 = vld [vmem:[%s1886_s18 + $0x54] ss:$8 sps:$4 sm:$0xff]   ;;  %v1653_v40 = vld [vmem:[%s1886_s18 + $0x50] ss:$8 sps:$4 sm:$0xff]  }
  0x3e   : > { %687 = vmatprep.mubr.bf16.mxu1 %v1647_v29  ;;  %v1654_v41 = vld [vmem:[%s1886_s18 + $0x24] ss:$8 sps:$4 sm:$0xff]   ;;  %v1658_v43 = vld [vmem:[%s1886_s18 + $0x20] ss:$8 sps:$4 sm:$0xff]   ;;  %v1660_v45 = vld [vmem:[%s1886_s18 + $0x34] ss:$8 sps:$4 sm:$0xff]  }
  0x3f   : > { %v1656_v42 = vld [vmem:[%s1886_s18 + $0x64] ss:$8 sps:$4 sm:$0xff]   ;;  %v1659_v44 = vld [vmem:[%s1886_s18 + $0x60] ss:$8 sps:$4 sm:$0xff]   ;;  %v1662_v46 = vld [vmem:[%s1886_s18 + $0x74] ss:$8 sps:$4 sm:$0xff]  }
  0x40   : > { %1430 = vmatpush3.bf16.msra.mxu0 %v1631_v22  ;;  %1547 = vmatpush3.bf16.msra.mxu1 %v1631_v22  ;;  %v1664_v47 = vld [vmem:[%s1886_s18 + $0x30] ss:$8 sps:$4 sm:$0xff]   ;;  %v383_v51 = vld [vmem:[#allocation2] sm:$0xff]  ;;  %v384_v59 = vld [vmem:[#allocation2 + $0x8] sm:$0xff] }
  0x41   : > { %1431 = vmatprep.subr.bf16.mxu0 %v1632_v23  ;;  %1540 = vmatprep.subr.bf16.mxu1 %v1632_v23  ;;  %v1665_v48 = vld [vmem:[%s1886_s18 + $0x70] ss:$8 sps:$4 sm:$0xff]   ;;  %v391_v53 = vld [vmem:[#allocation2 + $0x40] sm:$0xff]  ;;  %v392_v61 = vld [vmem:[#allocation2 + $0x48] sm:$0xff] }
  0x42   : > { %v385_v7 = vld [vmem:[#allocation2 + $0x10] sm:$0xff]  ;;  %v386_v15 = vld [vmem:[#allocation2 + $0x18] sm:$0xff]  ;;  %v395_v29 = vld [vmem:[#allocation2 + $0x60] sm:$0xff] }
  0x43   : > { %v393_v9 = vld [vmem:[#allocation2 + $0x50] sm:$0xff]  ;;  %v394_v17 = vld [vmem:[#allocation2 + $0x58] sm:$0xff] }
  0x44   : > { %1432 = vmatpush3.bf16.msra.mxu0 %v1633_v24  ;;  %1548 = vmatpush3.bf16.msra.mxu1 %v1633_v24 }
  0x45   : > { %1433 = vmatprep.subr.bf16.mxu0 %v1634_v25  ;;  %1541 = vmatprep.subr.bf16.mxu1 %v1634_v25 }
  0x48   : > { %1434 = vmatpush3.bf16.msra.mxu0 %v1635_v26  ;;  %1549 = vmatpush3.bf16.msra.mxu1 %v1635_v26 }
  0x49   : > { %1435 = vmatprep.subr.bf16.mxu0 %v1636_v27  ;;  %1542 = vmatprep.subr.bf16.mxu1 %v1636_v27  ;;  %v387_v27 = vld [vmem:[#allocation2 + $0x20] sm:$0xff] }
  0x4c   : > { %1436 = vmatpush3.bf16.msra.mxu0 %v1637_v30  ;;  %1550 = vmatpush3.bf16.msra.mxu1 %v1637_v30 }
  0x4d   : > { %1437 = vmatprep.subr.bf16.mxu0 %v1638_v31  ;;  %1543 = vmatprep.subr.bf16.mxu1 %v1638_v31 }
  0x50   : > { %1438 = vmatpush3.bf16.msra.mxu0 %v1639_v32  ;;  %1551 = vmatpush3.bf16.msra.mxu1 %v1639_v32 }
  0x51   : > { %1439 = vmatprep.subr.bf16.mxu0 %v1640_v33  ;;  %1544 = vmatprep.subr.bf16.mxu1 %v1640_v33 }
  0x54   : > { %1440 = vmatpush3.bf16.msra.mxu0 %v1641_v34  ;;  %1552 = vmatpush3.bf16.msra.mxu1 %v1641_v34 }
  0x57   : > { %656 = vmatmul.mubr.bf16.vlgmr.msra.gmra.mrb[0].mxu0 %v1642_v35  ;;  %688 = vmatmul.mubr.bf16.vlgmr.msra.gmra.mrb[0].mxu1 %v1645_v36  ;;  %v388_v35 = vld [vmem:[#allocation2 + $0x28] sm:$0xff] }
  0x58   : > { %663 = vmatprep.mubr.bf16.mxu0 %v1648_v37  ;;  %695 = vmatprep.mubr.bf16.mxu1 %v1650_v38  ;;  %v396_v37 = vld [vmem:[#allocation2 + $0x68] sm:$0xff] }
  0x5f   : > { %664 = vmatmul.mubr.bf16.gmra.mrb[4].mxu0 %v1652_v39  ;;  %696 = vmatmul.mubr.bf16.gmra.mrb[4].mxu1 %v1653_v40 }
  0x60   : > { %671 = vmatprep.mubr.bf16.mxu0 %v1654_v41  ;;  %703 = vmatprep.mubr.bf16.mxu1 %v1656_v42 }
  0x67   : > { %672 = vmatmul.mubr.bf16.gmra.mrb[8].mxu0 %v1658_v43  ;;  %704 = vmatmul.mubr.bf16.gmra.mrb[8].mxu1 %v1659_v44 }
  0x68   : > { %679 = vmatprep.mubr.bf16.mxu0 %v1660_v45  ;;  %711 = vmatprep.mubr.bf16.mxu1 %v1662_v46 }
  0x6f   : > { %680 = vmatmul.mubr.bf16.gmra.mrb[12].mxu0 %v1664_v47  ;;  %712 = vmatmul.mubr.bf16.gmra.mrb[12].mxu1 %v1665_v48  ;;  %v389_v47 = vld [vmem:[#allocation2 + $0x30] sm:$0xff] }
 0x12a   : > { %v1441_v49 = vpop.f32.mrb[0].mxu0  ;;  %v1465_v50 = vpop.f32.mrb[0].mxu1 }
 0x12b   : > { %v1442_v52 = vpop.f32.mrb[1].mxu0  ;;  %v1466_v54 = vpop.f32.mrb[1].mxu1 }
 0x12c   : > { %v1443_v55 = vadd.f32 %v1442_v52, %v1441_v49  ;;  %v1467_v56 = vadd.f32 %v1466_v54, %v1465_v50  ;;  %v1444_v57 = vpop.f32.mrb[2].mxu0  ;;  %v1468_v58 = vpop.f32.mrb[2].mxu1  ;;  %v397_v49 = vld [vmem:[#allocation2 + $0x70] sm:$0xff] }
 0x12d   : > { %v1445_v60 = vpop.f32.mrb[3].mxu0  ;;  %v1469_v62 = vpop.f32.mrb[3].mxu1 }
 0x12e   : > { %v720_v63 = vadd.f32 %v1443_v55, %v383_v51  ;;  %v728_v0 = vadd.f32 %v1467_v56, %v391_v53  ;;  %v1446_v1 = vadd.f32 %v1445_v60, %v1444_v57  ;;  %v1470_v2 = vadd.f32 %v1469_v62, %v1468_v58  ;;  %v390_v55 = vld [vmem:[#allocation2 + $0x38] sm:$0xff] }
 0x12f   : > { %v398_v57 = vld [vmem:[#allocation2 + $0x78] sm:$0xff] }
 0x130   : > { %736 = vst [vmem:[#allocation2] sm:$0xff] %v720_v63  ;;  %744 = vst [vmem:[#allocation2 + $0x40] sm:$0xff] %v728_v0  ;;  %v721_v3 = vadd.f32 %v1446_v1, %v384_v59  ;;  %v729_v4 = vadd.f32 %v1470_v2, %v392_v61  ;;  %v1666_v1 = vld [vmem:[%s2112_s3] sm:$0xff] (!%p1316_p13)   ;;  %v1667_v2 = vld [vmem:[%s2112_s3 + $0x8] sm:$0xff] (!%p1316_p13)  }
 0x131   : > { %1505 = vmatprep.subr.bf16.mxu0 (!%p1316_p13), %v1666_v1  ;;  %1553 = vmatprep.subr.bf16.mxu1 (!%p1316_p13), %v1666_v1 }
 0x132   : > { %737 = vst [vmem:[#allocation2 + $0x8] sm:$0xff] %v721_v3  ;;  %745 = vst [vmem:[#allocation2 + $0x48] sm:$0xff] %v729_v4  ;;  %v1447_v5 = vpop.f32.mrb[4].mxu0  ;;  %v1471_v6 = vpop.f32.mrb[4].mxu1  ;;  %1506 = vmatpush3.bf16.msra.mxu0 (!%p1316_p13), %v1666_v1  ;;  %1561 = vmatpush3.bf16.msra.mxu1 (!%p1316_p13), %v1666_v1  ;;  %v1668_v3 = vld [vmem:[%s2112_s3 + $0x10] sm:$0xff] (!%p1316_p13)   ;;  %v1669_v4 = vld [vmem:[%s2112_s3 + $0x18] sm:$0xff] (!%p1316_p13)  }
 0x133   : > { %v1448_v8 = vpop.f32.mrb[5].mxu0  ;;  %v1472_v10 = vpop.f32.mrb[5].mxu1  ;;  %1507 = vmatprep.subr.bf16.mxu0 (!%p1316_p13), %v1667_v2  ;;  %1554 = vmatprep.subr.bf16.mxu1 (!%p1316_p13), %v1667_v2 }
 0x134   : > { %v1449_v11 = vadd.f32 %v1448_v8, %v1447_v5  ;;  %v1473_v12 = vadd.f32 %v1472_v10, %v1471_v6  ;;  %v1450_v13 = vpop.f32.mrb[6].mxu0  ;;  %v1474_v14 = vpop.f32.mrb[6].mxu1 }
 0x135   : > { %v1451_v16 = vpop.f32.mrb[7].mxu0  ;;  %v1475_v18 = vpop.f32.mrb[7].mxu1 }
 0x136   : > { %v722_v19 = vadd.f32 %v1449_v11, %v385_v7  ;;  %v730_v20 = vadd.f32 %v1473_v12, %v393_v9  ;;  %v1452_v21 = vadd.f32 %v1451_v16, %v1450_v13  ;;  %v1476_v22 = vadd.f32 %v1475_v18, %v1474_v14  ;;  %1508 = vmatpush3.bf16.msra.mxu0 (!%p1316_p13), %v1667_v2 }
 0x137   : > { %1562 = vmatpush3.bf16.msra.mxu1 (!%p1316_p13), %v1667_v2  ;;  %1509 = vmatprep.subr.bf16.mxu0 (!%p1316_p13), %v1668_v3  ;;  %v1934_v5 = vld [vmem:[#allocation2] sm:$0xff] (!%p1316_p13) }
 0x138   : > { %738 = vst [vmem:[#allocation2 + $0x10] sm:$0xff] %v722_v19  ;;  %746 = vst [vmem:[#allocation2 + $0x50] sm:$0xff] %v730_v20  ;;  %v723_v23 = vadd.f32 %v1452_v21, %v386_v15  ;;  %v731_v24 = vadd.f32 %v1476_v22, %v394_v17  ;;  %1555 = vmatprep.subr.bf16.mxu1 (!%p1316_p13), %v1668_v3  ;;  %v772_v7 = vmin.f32 (!%p1316_p13), %v1934_v5, 0.0  ;;  %v1940_v9 = vld [vmem:[#allocation2 + $0x40] sm:$0xff] (!%p1316_p13)  ;;  %vm852_vm0 = vcmp.gt.f32.partialorder (!%p1316_p13), %v1934_v5, 0.0 }
 0x139   : > { %v1936_v6 = vld [vmem:[#allocation2 + $0x8] sm:$0xff] (!%p1316_p13)  ;;  %v780_v11 = vmin.f32 (!%p1316_p13), %v1940_v9, 0.0  ;;  %v1670_v19 = vld [vmem:[%s2112_s3 + $0x20] sm:$0xff] (!%p1316_p13)   ;;  %vm860_vm2 = vcmp.gt.f32.partialorder (!%p1316_p13), %v1940_v9, 0.0 }
 0x13a   : > { %739 = vst [vmem:[#allocation2 + $0x18] sm:$0xff] %v723_v23  ;;  %747 = vst [vmem:[#allocation2 + $0x58] sm:$0xff] %v731_v24  ;;  %v1453_v25 = vpop.f32.mrb[8].mxu0  ;;  %v1477_v26 = vpop.f32.mrb[8].mxu1  ;;  %v773_v8 = vmin.f32 (!%p1316_p13), %v1936_v6, 0.0  ;;  %v1942_v10 = vld [vmem:[#allocation2 + $0x48] sm:$0xff] (!%p1316_p13)  ;;  %1510 = vmatpush3.bf16.msra.mxu0 (!%p1316_p13), %v1668_v3 }
 0x13b   : > { %v1454_v28 = vpop.f32.mrb[9].mxu0  ;;  %v1478_v30 = vpop.f32.mrb[9].mxu1  ;;  %v781_v12 = vmin.f32 (!%p1316_p13), %v1942_v10, 0.0  ;;  %1563 = vmatpush3.bf16.msra.mxu1 (!%p1316_p13), %v1668_v3  ;;  %v788_v15 = vmul.f32 (!%p1316_p13), 1.442695, %v772_v7  ;;  %1511 = vmatprep.subr.bf16.mxu0 (!%p1316_p13), %v1669_v4  ;;  %vm853_vm1 = vcmp.gt.f32.partialorder (!%p1316_p13), %v1936_v6, 0.0 }
 0x13c   : > { %v1455_v31 = vadd.f32 %v1454_v28, %v1453_v25  ;;  %v1479_v32 = vadd.f32 %v1478_v30, %v1477_v26  ;;  %v1456_v33 = vpop.f32.mrb[10].mxu0  ;;  %v1480_v34 = vpop.f32.mrb[10].mxu1  ;;  %v790_v16 = vmul.f32 (!%p1316_p13), 1.442695, %v773_v8  ;;  %1556 = vmatprep.subr.bf16.mxu1 (!%p1316_p13), %v1669_v4  ;;  %v804_v20 = vmul.f32 (!%p1316_p13), 1.442695, %v780_v11 }
 0x13d   : > { %v1457_v36 = vpop.f32.mrb[11].mxu0  ;;  %v1481_v38 = vpop.f32.mrb[11].mxu1  ;;  %v806_v21 = vmul.f32 (!%p1316_p13), 1.442695, %v781_v12  ;;  %1674 = vpow2.f32 (!%p1316_p13), %v788_v15  ;;  %v1671_v30 = vld [vmem:[%s2112_s3 + $0x28] sm:$0xff] (!%p1316_p13)   ;;  %vm861_vm3 = vcmp.gt.f32.partialorder (!%p1316_p13), %v1942_v10, 0.0 }
 0x13e   : > { %v724_v39 = vadd.f32 %v1455_v31, %v387_v27  ;;  %v732_v40 = vadd.f32 %v1479_v32, %v395_v29  ;;  %v1458_v41 = vadd.f32 %v1457_v36, %v1456_v33  ;;  %v1482_v42 = vadd.f32 %v1481_v38, %v1480_v34  ;;  %1512 = vmatpush3.bf16.msra.mxu0 (!%p1316_p13), %v1669_v4  ;;  %v2008_v8 = vld [vmem:[%s2111_s2] ss:$0 sm:$0xff] (!%p1316_p13) }
 0x13f   : > { %v1946_v13 = vld [vmem:[#allocation2 + $0x10] sm:$0xff] (!%p1316_p13)  ;;  %1676 = vpow2.f32 (!%p1316_p13), %v790_v16  ;;  %1564 = vmatpush3.bf16.msra.mxu1 (!%p1316_p13), %v1669_v4  ;;  %1513 = vmatprep.subr.bf16.mxu0 (!%p1316_p13), %v1670_v19 }
 0x140   : > { %740 = vst [vmem:[#allocation2 + $0x20] sm:$0xff] %v724_v39  ;;  %748 = vst [vmem:[#allocation2 + $0x60] sm:$0xff] %v732_v40  ;;  %v725_v43 = vadd.f32 %v1458_v41, %v388_v35  ;;  %v733_v44 = vadd.f32 %v1482_v42, %v396_v37  ;;  %v774_v17 = vmin.f32 (!%p1316_p13), %v1946_v13, 0.0  ;;  %v1955_v23 = vld [vmem:[#allocation2 + $0x50] sm:$0xff] (!%p1316_p13)  ;;  %1678 = vpow2.f32 (!%p1316_p13), %v804_v20  ;;  %1557 = vmatprep.subr.bf16.mxu1 (!%p1316_p13), %v1670_v19 }
 0x141   : > { %v1948_v14 = vld [vmem:[#allocation2 + $0x18] sm:$0xff] (!%p1316_p13)  ;;  %v782_v26 = vmin.f32 (!%p1316_p13), %v1955_v23, 0.0  ;;  %1680 = vpow2.f32 (!%p1316_p13), %v806_v21  ;;  %vm854_vm4 = vcmp.gt.f32.partialorder (!%p1316_p13), %v1946_v13, 0.0  ;;  %vm862_vm6 = vcmp.gt.f32.partialorder (!%p1316_p13), %v1955_v23, 0.0 }
 0x142   : > { %741 = vst [vmem:[#allocation2 + $0x28] sm:$0xff] %v725_v43  ;;  %749 = vst [vmem:[#allocation2 + $0x68] sm:$0xff] %v733_v44  ;;  %v1459_v45 = vpop.f32.mrb[12].mxu0  ;;  %v1483_v46 = vpop.f32.mrb[12].mxu1  ;;  %v775_v18 = vmin.f32 (!%p1316_p13), %v1948_v14, 0.0  ;;  %v1957_v24 = vld [vmem:[#allocation2 + $0x58] sm:$0xff] (!%p1316_p13)  ;;  %1514 = vmatpush3.bf16.msra.mxu0 (!%p1316_p13), %v1670_v19 }
 0x143   : > { %v1460_v48 = vpop.f32.mrb[13].mxu0  ;;  %v1484_v50 = vpop.f32.mrb[13].mxu1  ;;  %v792_v22 = vmul.f32 (!%p1316_p13), 1.442695, %v774_v17  ;;  %v783_v27 = vmin.f32 (!%p1316_p13), %v1957_v24, 0.0  ;;  %1565 = vmatpush3.bf16.msra.mxu1 (!%p1316_p13), %v1670_v19  ;;  %1515 = vmatprep.subr.bf16.mxu0 (!%p1316_p13), %v1671_v30  ;;  %vm855_vm5 = vcmp.gt.f32.partialorder (!%p1316_p13), %v1948_v14, 0.0 }
 0x144   : > { %v1461_v51 = vadd.f32 %v1460_v48, %v1459_v45  ;;  %v1485_v52 = vadd.f32 %v1484_v50, %v1483_v46  ;;  %v1462_v53 = vpop.f32.mrb[14].mxu0  ;;  %v1486_v54 = vpop.f32.mrb[14].mxu1  ;;  %755 = sbr.rel (%p1316_p13) target bundleno = 586 (0x24a), region = 86  ;;  %v794_v25 = vmul.f32 (!%p1316_p13), 1.442695, %v775_v18  ;;  %1558 = vmatprep.subr.bf16.mxu1 (!%p1316_p13), %v1671_v30  ;;  %vm863_vm7 = vcmp.gt.f32.partialorder (!%p1316_p13), %v1957_v24, 0.0 }
 0x145   : > { %v1463_v56 = vpop.f32.mrb[15].mxu0  ;;  %v1487_v58 = vpop.f32.mrb[15].mxu1  ;;  %v808_v35 = vmul.f32 (!%p1316_p13), 1.442695, %v782_v26  ;;  %v810_v36 = vmul.f32 (!%p1316_p13), 1.442695, %v783_v27  ;;  %1682 = vpow2.f32 (!%p1316_p13), %v792_v22 }
 0x146   : > { %v726_v59 = vadd.f32 %v1461_v51, %v389_v47  ;;  %v734_v60 = vadd.f32 %v1485_v52, %v397_v49  ;;  %v1464_v61 = vadd.f32 %v1463_v56, %v1462_v53  ;;  %v1488_v62 = vadd.f32 %v1487_v58, %v1486_v54  ;;  %v1672_v47 = vld [vmem:[%s2112_s3 + $0x30] sm:$0xff] (!%p1316_p13)   ;;  %1516 = vmatpush3.bf16.msra.mxu0 (!%p1316_p13), %v1671_v30  ;;  %v1673_v56 = vld [vmem:[%s2112_s3 + $0x38] sm:$0xff] (!%p1316_p13)  }
 0x147   : > { %v1961_v28 = vld [vmem:[#allocation2 + $0x20] sm:$0xff] (!%p1316_p13)  ;;  %1684 = vpow2.f32 (!%p1316_p13), %v794_v25  ;;  %v1675_v54 = vpop.eup (!%p1316_p13), %1674  ;;  %1566 = vmatpush3.bf16.msra.mxu1 (!%p1316_p13), %v1671_v30  ;;  %1517 = vmatprep.subr.bf16.mxu0 (!%p1316_p13), %v1672_v47 }
 0x148   : > { %742 = vst [vmem:[#allocation2 + $0x30] sm:$0xff] %v726_v59  ;;  %750 = vst [vmem:[#allocation2 + $0x70] sm:$0xff] %v734_v60  ;;  %v727_v63 = vadd.f32 %v1464_v61, %v390_v55  ;;  %v735_v0 = vadd.f32 %v1488_v62, %v398_v57  ;;  %v776_v31 = vmin.f32 (!%p1316_p13), %v1961_v28, 0.0  ;;  %v1970_v33 = vld [vmem:[#allocation2 + $0x60] sm:$0xff] (!%p1316_p13)  ;;  %1686 = vpow2.f32 (!%p1316_p13), %v808_v35  ;;  %1559 = vmatprep.subr.bf16.mxu1 (!%p1316_p13), %v1672_v47 }
 0x149   : > { %v1963_v29 = vld [vmem:[#allocation2 + $0x28] sm:$0xff] (!%p1316_p13)  ;;  %v784_v41 = vmin.f32 (!%p1316_p13), %v1970_v33, 0.0  ;;  %1688 = vpow2.f32 (!%p1316_p13), %v810_v36  ;;  %v1677_v55 = vpop.eup (!%p1316_p13), %1676  ;;  %v1317_v57 = vadd.f32 (!%p1316_p13), -1.0, %v1675_v54  ;;  %vm856_vm8 = vcmp.gt.f32.partialorder (!%p1316_p13), %v1961_v28, 0.0 }
 0x14a   : > { %743 = vst [vmem:[#allocation2 + $0x38] sm:$0xff] %v727_v63  ;;  %751 = vst [vmem:[#allocation2 + $0x78] sm:$0xff] %v735_v0  ;;  %v777_v32 = vmin.f32 (!%p1316_p13), %v1963_v29, 0.0  ;;  %v1972_v34 = vld [vmem:[#allocation2 + $0x68] sm:$0xff] (!%p1316_p13)  ;;  %v796_v39 = vmul.f32 (!%p1316_p13), 1.442695, %v776_v31  ;;  %v1679_v60 = vpop.eup (!%p1316_p13), %1678  ;;  %1518 = vmatpush3.bf16.msra.mxu0 (!%p1316_p13), %v1672_v47 }
 0x14b   : > { %v785_v42 = vmin.f32 %v1972_v34, 0.0  ;;  %v812_v48 = vmul.f32 1.442695, %v784_v41  ;;  %v1318_v61 = vadd.f32 -1.0, %v1677_v55  ;;  %v1681_v62 = vpop.eup %1680  ;;  %v836_v63 = vmul.f32 1.6732632, %v1317_v57  ;;  %1567 = vmatpush3.bf16.msra.mxu1 %v1672_v47  ;;  %1519 = vmatprep.subr.bf16.mxu0 %v1673_v56 }
 0x14c   : > { %v798_v40 = vmul.f32 1.442695, %v777_v32  ;;  %1690 = vpow2.f32 %v796_v39  ;;  %v1325_v0 = vadd.f32 -1.0, %v1679_v60  ;;  %v1326_v3 = vadd.f32 -1.0, %v1681_v62  ;;  %1560 = vmatprep.subr.bf16.mxu1 %v1673_v56 }
 0x14d   : > { %v814_v49 = vmul.f32 1.442695, %v785_v42  ;;  %v837_v2 = vmul.f32 1.6732632, %v1318_v61  ;;  %v868_v7 = vsel %vm852_vm0, %v1934_v5, %v836_v63  ;;  %vm857_vm9 = vcmp.gt.f32.partialorder %v1963_v29, 0.0 }
 0x14e   : > { %1692 = vpow2.f32 %v798_v40  ;;  %v844_v11 = vmul.f32 1.6732632, %v1325_v0  ;;  %v884_v17 = vmul.f32 1.050701, %v868_v7  ;;  %v845_v18 = vmul.f32 1.6732632, %v1326_v3  ;;  %1520 = vmatpush3.bf16.msra.mxu0 %v1673_v56 }
 0x14f   : > { %v1974_v37 = vld [vmem:[#allocation2 + $0x30] sm:$0xff]  ;;  %1694 = vpow2.f32 %v812_v48  ;;  %v1683_v1 = vpop.eup %1682  ;;  %v869_v16 = vsel %vm853_vm1, %v1936_v6, %v837_v2  ;;  %1568 = vmatpush3.bf16.msra.mxu1 %v1673_v56  ;;  %vm864_vm10 = vcmp.gt.f32.partialorder %v1970_v33, 0.0  ;;  %vm865_vm11 = vcmp.gt.f32.partialorder %v1972_v34, 0.0 }
 0x150   : > { %v778_v43 = vmin.f32 %v1974_v37, 0.0  ;;  %v1982_v45 = vld [vmem:[#allocation2 + $0x70] sm:$0xff]  ;;  %1696 = vpow2.f32 %v814_v49  ;;  %v1319_v12 = vadd.f32 -1.0, %v1683_v1  ;;  %v885_v20 = vmul.f32 1.050701, %v869_v16 }
 0x151   : > { %v1976_v38 = vld [vmem:[#allocation2 + $0x38] sm:$0xff]  ;;  %v786_v52 = vmin.f32 %v1982_v45, 0.0  ;;  %v1685_v4 = vpop.eup %1684  ;;  %v876_v21 = vsel %vm860_vm2, %v1940_v9, %v844_v11  ;;  %v907_v27 = vadd.f32 %v2008_v8, %v884_v17  ;;  %v877_v6 = vsel %vm861_vm3, %v1942_v10, %v845_v18 }
 0x152   : > { %v779_v44 = vmin.f32 %v1976_v38, 0.0  ;;  %v1984_v46 = vld [vmem:[#allocation2 + $0x78] sm:$0xff]  ;;  %v800_v50 = vmul.f32 1.442695, %v778_v43  ;;  %v1687_v15 = vpop.eup %1686  ;;  %v1320_v5 = vadd.f32 -1.0, %v1685_v4  ;;  %v908_v35 = vadd.f32 %v2008_v8, %v885_v20 }
 0x153   : > { %v787_v53 = vmin.f32 %v1984_v46, 0.0  ;;  %v816_v58 = vmul.f32 1.442695, %v786_v52  ;;  %v1689_v19 = vpop.eup %1688  ;;  %v838_v22 = vmul.f32 1.6732632, %v1319_v12  ;;  %v1327_v25 = vadd.f32 -1.0, %v1687_v15 }
 0x154   : > { %v802_v51 = vmul.f32 1.442695, %v779_v44  ;;  %1698 = vpow2.f32 %v800_v50  ;;  %v892_v30 = vmul.f32 1.050701, %v876_v21  ;;  %v839_v31 = vmul.f32 1.6732632, %v1320_v5 }
 0x155   : > { %v818_v59 = vmul.f32 1.442695, %v787_v53  ;;  %v893_v36 = vmul.f32 1.050701, %v877_v6  ;;  %v870_v9 = vsel %vm854_vm4, %v1946_v13, %v838_v22  ;;  %v1328_v39 = vadd.f32 -1.0, %v1689_v19 }
 0x156   : > { %1700 = vpow2.f32 %v802_v51  ;;  %v1691_v26 = vpop.eup %1690  ;;  %vm858_vm12 = vcmp.gt.f32.partialorder %v1974_v37, 0.0  ;;  %v915_v10 = vadd.f32 %v2008_v8, %v892_v30  ;;  %v871_v41 = vsel %vm855_vm5, %v1948_v14, %v839_v31 }
 0x157   : > { %1702 = vpow2.f32 %v816_v58  ;;  %v886_v42 = vmul.f32 1.050701, %v870_v9  ;;  %v846_v43 = vmul.f32 1.6732632, %v1327_v25  ;;  %v923_v47 = vpack.c.bf16 %v908_v35, %v907_v27 }
 0x158   : > { %1704 = vpow2.f32 %v818_v59  ;;  %v1693_v32 = vpop.eup %1692  ;;  %v916_v48 = vadd.f32 %v2008_v8, %v893_v36  ;;  %v887_v49 = vmul.f32 1.050701, %v871_v41  ;;  %v847_v13 = vmul.f32 1.6732632, %v1328_v39 }
 0x159   : > { %v1695_v40 = vpop.eup %1694  ;;  %vm859_vm13 = vcmp.gt.f32.partialorder %v1976_v38, 0.0  ;;  %v909_v51 = vadd.f32 %v2008_v8, %v886_v42  ;;  %v878_v52 = vsel %vm862_vm6, %v1955_v23, %v846_v43  ;;  %v1321_v53 = vadd.f32 -1.0, %v1691_v26  ;;  %1521 = vmatprep.mubr.bf16.mxu0 %v923_v47 }
 0x15a   : > { %v1697_v44 = vpop.eup %1696  ;;  %v1322_v54 = vadd.f32 -1.0, %v1693_v32  ;;  %v927_v55 = vpack.c.bf16 %v916_v48, %v915_v10  ;;  %v910_v56 = vadd.f32 %v2008_v8, %v887_v49  ;;  %v879_v57 = vsel %vm863_vm7, %v1957_v24, %v847_v13 }
 0x15b   : > { %v894_v58 = vmul.f32 1.050701, %v878_v52  ;;  %vm866_vm14 = vcmp.gt.f32.partialorder %v1982_v45, 0.0  ;;  %v895_v60 = vmul.f32 1.050701, %v879_v57  ;;  %v1329_v1 = vadd.f32 -1.0, %v1695_v40 }
 0x15c   : > { %v840_v61 = vmul.f32 1.6732632, %v1321_v53  ;;  %v841_v62 = vmul.f32 1.6732632, %v1322_v54  ;;  %1529 = vmatprep.mubr.bf16.mxu1 %v927_v55  ;;  %v924_v23 = vpack.c.bf16 %v910_v56, %v909_v51  ;;  %v1330_v2 = vadd.f32 -1.0, %v1697_v44 }
 0x15d   : > { %v917_v0 = vadd.f32 %v2008_v8, %v894_v58  ;;  %v918_v3 = vadd.f32 %v2008_v8, %v895_v60  ;;  %v848_v15 = vmul.f32 1.6732632, %v1329_v1  ;;  %vm867_vm15 = vcmp.gt.f32.partialorder %v1984_v46, 0.0 }
 0x15e   : > { %v1699_v50 = vpop.eup %1698  ;;  %v872_v24 = vsel %vm856_vm8, %v1961_v28, %v840_v61  ;;  %v873_v4 = vsel %vm857_vm9, %v1963_v29, %v841_v62  ;;  %1522 = vmatmul.mubr.bf16.vlgmr.msra.gmra.mrb[0].mxu0 %v924_v23  ;;  %v849_v17 = vmul.f32 1.6732632, %v1330_v2 }
 0x15f   : > { %v1323_v7 = vadd.f32 -1.0, %v1699_v50  ;;  %v888_v11 = vmul.f32 1.050701, %v872_v24  ;;  %v889_v12 = vmul.f32 1.050701, %v873_v4  ;;  %v928_v16 = vpack.c.bf16 %v918_v3, %v917_v0 }
 0x160   : > { %v1701_v14 = vpop.eup %1700  ;;  %v880_v28 = vsel %vm864_vm10, %v1970_v33, %v848_v15  ;;  %v881_v29 = vsel %vm865_vm11, %v1972_v34, %v849_v17 }
 0x161   : > { %v1703_v59 = vpop.eup %1702  ;;  %v1324_v18 = vadd.f32 -1.0, %v1701_v14  ;;  %v842_v5 = vmul.f32 1.6732632, %v1323_v7  ;;  %v911_v19 = vadd.f32 %v2008_v8, %v888_v11  ;;  %v912_v20 = vadd.f32 %v2008_v8, %v889_v12  ;;  %1530 = vmatmul.mubr.bf16.vlgmr.msra.gmra.mrb[0].mxu1 %v928_v16 }
 0x162   : > { %v1705_v63 = vpop.eup %1704  ;;  %v1331_v21 = vadd.f32 -1.0, %v1703_v59  ;;  %v896_v22 = vmul.f32 1.050701, %v880_v28  ;;  %v897_v6 = vmul.f32 1.050701, %v881_v29 }
 0x163   : > { %v843_v25 = vmul.f32 1.6732632, %v1324_v18  ;;  %v874_v26 = vsel %vm858_vm12, %v1974_v37, %v842_v5  ;;  %v925_v27 = vpack.c.bf16 %v912_v20, %v911_v19  ;;  %v1332_v31 = vadd.f32 -1.0, %v1705_v63 }
 0x164   : > { %v890_v30 = vmul.f32 1.050701, %v874_v26  ;;  %v919_v32 = vadd.f32 %v2008_v8, %v896_v22  ;;  %v850_v35 = vmul.f32 1.6732632, %v1331_v21  ;;  %v920_v34 = vadd.f32 %v2008_v8, %v897_v6 }
 0x165   : > { %v875_v33 = vsel %vm859_vm13, %v1976_v38, %v843_v25  ;;  %1525 = vmatprep.mubr.bf16.mxu0 %v925_v27  ;;  %v851_v37 = vmul.f32 1.6732632, %v1332_v31 }
 0x166   : > { %v891_v36 = vmul.f32 1.050701, %v875_v33  ;;  %v913_v9 = vadd.f32 %v2008_v8, %v890_v30  ;;  %v882_v39 = vsel %vm866_vm14, %v1982_v45, %v850_v35  ;;  %v929_v40 = vpack.c.bf16 %v920_v34, %v919_v32  ;;  %v1334_v45 = vld [vmem:[%s2113_s4] ss:$0 sm:$0xff] }
 0x167   : > { %v883_v41 = vsel %vm867_vm15, %v1984_v46, %v851_v37  ;;  %v898_v38 = vmul.f32 1.050701, %v882_v39 }
 0x168   : > { %v914_v10 = vadd.f32 %v2008_v8, %v891_v36  ;;  %v899_v42 = vmul.f32 1.050701, %v883_v41  ;;  %1533 = vmatprep.mubr.bf16.mxu1 %v929_v40 }
 0x169   : > { %v921_v44 = vadd.f32 %v2008_v8, %v898_v38 }
 0x16a   : > { %v926_v43 = vpack.c.bf16 %v914_v10, %v913_v9  ;;  %v922_v47 = vadd.f32 %v2008_v8, %v899_v42 }
 0x16c   : > { %1526 = vmatmul.mubr.bf16.gmra.mrb[4].mxu0 %v926_v43  ;;  %v930_v48 = vpack.c.bf16 %v922_v47, %v921_v44 }
 0x16e   : > { %1534 = vmatmul.mubr.bf16.gmra.mrb[4].mxu1 %v930_v48 }
 0x231   : > { %v1523_v49 = vpop.f32.mrb[0].mxu0 }
 0x232   : > { %v1036_v13 = vpop.f32.mrb[1].mxu0  ;;  %v1045_v46 = vadd.f32 %v1523_v49, %v1334_v45 }
 0x233   : > { %v1524_v50 = vpop.f32.mrb[2].mxu0  ;;  %v1037_v54 = vadd.f32 %v1334_v45, %v1036_v13 }
 0x234   : > { %v1531_v51 = vpop.f32.mrb[0].mxu1  ;;  %v1048_v52 = vadd.f32 %v1524_v50, %v1334_v45  ;;  %v1039_v53 = vpop.f32.mrb[3].mxu0 }
 0x235   : > { %v1068_v8 = vpop.f32.mrb[1].mxu1  ;;  %v1040_v14 = vadd.f32 %v1334_v45, %v1039_v53  ;;  %v1077_v57 = vadd.f32 %v1531_v51, %v1334_v45 }
 0x236   : > { %v1386_v55 = vpack.c.bf16 %v1048_v52, %v1045_v46  ;;  %v1532_v56 = vpop.f32.mrb[2].mxu1  ;;  %v1069_v61 = vadd.f32 %v1334_v45, %v1068_v8 }
 0x237   : > { %v1080_v58 = vadd.f32 %v1532_v56, %v1334_v45  ;;  %v1381_v59 = vpack.c.bf16 %v1040_v14, %v1037_v54  ;;  %v1071_v60 = vpop.f32.mrb[3].mxu1 }
 0x238   : > { %1418 = vst [vmem:[%s1884_s13 + $0x8] sm:$0xff] %v1386_v55   ;;  %v1072_v62 = vadd.f32 %v1334_v45, %v1071_v60 }
 0x239   : > { %v1406_v63 = vpack.c.bf16 %v1080_v58, %v1077_v57  ;;  %1382 = vst [vmem:[%s1884_s13] sm:$0xff] %v1381_v59  }
 0x23a   : > { %v1401_v23 = vpack.c.bf16 %v1072_v62, %v1069_v61 }
 0x23b   : > { %1422 = vst [vmem:[%s1884_s13 + $0x28] sm:$0xff] %v1406_v63  }
 0x23c   : > { %1421 = vst [vmem:[%s1884_s13 + $0x20] sm:$0xff] %v1401_v23  }
 0x23f   : > { %v1527_v0 = vpop.f32.mrb[4].mxu0 }
 0x240   : > { %v1052_v1 = vpop.f32.mrb[5].mxu0  ;;  %v1061_v3 = vadd.f32 %v1527_v0, %v1334_v45 }
 0x241   : > { %v1528_v2 = vpop.f32.mrb[6].mxu0  ;;  %v1535_v24 = vpop.f32.mrb[4].mxu1  ;;  %v1053_v11 = vadd.f32 %v1334_v45, %v1052_v1 }
 0x242   : > { %v1064_v4 = vadd.f32 %v1528_v2, %v1334_v45  ;;  %v1055_v7 = vpop.f32.mrb[7].mxu0  ;;  %v1084_v12 = vpop.f32.mrb[5].mxu1  ;;  %v1093_v18 = vadd.f32 %v1535_v24, %v1334_v45 }
 0x243   : > { %v1056_v15 = vadd.f32 %v1334_v45, %v1055_v7  ;;  %v1536_v17 = vpop.f32.mrb[6].mxu1  ;;  %v1085_v28 = vadd.f32 %v1334_v45, %v1084_v12 }
 0x244   : > { %v1396_v16 = vpack.c.bf16 %v1064_v4, %v1061_v3  ;;  %v1096_v5 = vadd.f32 %v1536_v17, %v1334_v45  ;;  %v1087_v20 = vpop.f32.mrb[7].mxu1 }
 0x245   : > { %v1391_v19 = vpack.c.bf16 %v1056_v15, %v1053_v11  ;;  %v1088_v21 = vadd.f32 %v1334_v45, %v1087_v20 }
 0x246   : > { %1420 = vst [vmem:[%s1884_s13 + $0x18] sm:$0xff] %v1396_v16   ;;  %v1416_v29 = vpack.c.bf16 %v1096_v5, %v1093_v18 }
 0x247   : > { %1419 = vst [vmem:[%s1884_s13 + $0x10] sm:$0xff] %v1391_v19   ;;  %v1411_v22 = vpack.c.bf16 %v1088_v21, %v1085_v28 }
 0x248   : > { %1424 = vst [vmem:[%s1884_s13 + $0x38] sm:$0xff] %v1416_v29  }
 0x249   : > { %1423 = vst [vmem:[%s1884_s13 + $0x30] sm:$0xff] %v1411_v22  }
 0x24a PF: > { %s15_s24 = sadd.s32 1, %s1760_s24   ;;  %s2115_s18 = smov %s1740_s19 }
 0x24b   : > { %p12_p0 = scmp.ge.s32.totalorder %s15_s24, 10   ;;  %s2116_s19 = smov %s1844_s6 }
 0x24c   : > { %s2117_s20 = smov %s1752_s22  ;;  %s2118_s21 = smov %s1756_s23 }
 0x24d   : > { %s2119_s22 = smov %s2122_s25  ;;  %s2120_s23 = smov %s2126_s26 }
 0x24e   :  { %14 = sbr.rel (!%p12_p0) target bundleno = 4 (0x4), region = 124 }

// kernel: _lambda_.5
= control target key start
LH: loop header
LB: loop body
LE: loop exit
PB: predicated region body
PF: predicated region fallthrough
CT: control target
= control target key end

     0   :  { %s1650_s18 = smov 0   ;;  %s1652_s19 = smov 0   ;;  %s1974_s0 = inlined_call_operand.vmem [shape: bf16[512,512], index: 0, kind: input, shape index: {}]   ;;  %s1975_s1 = inlined_call_operand.vmem [shape: bf16[512,128], index: 1, kind: input, shape index: {}]   ;;  %s1976_s2 = inlined_call_operand.vmem [shape: f32[1,128], index: 2, kind: input, shape index: {}]   ;;  %s1977_s3 = inlined_call_operand.vmem [shape: bf16[128,128], index: 3, kind: input, shape index: {}]   ;;  %s1978_s4 = inlined_call_operand.vmem [shape: f32[1,128], index: 4, kind: input, shape index: {}]   ;;  %s1979_s5 = inlined_call_operand.vmem [shape: f32[512,128], index: 5, kind: output, shape index: {}]  }
   0x1   :  { %s1654_s20 = smov 0   ;;  %s1656_s21 = smov 0  }
   0x2   :  { %s1658_s22 = smov 0   ;;  %s1660_s23 = smov 0  }
   0x3   :  { %s1662_s24 = smov 0  }
   0x4 LB: > { %s24_s25 = sadd.s32 1, %s1609_s22  ;;  %s27_s26 = sadd.s32 1, %s1613_s23  ;;  %s1617_s24 = sphi %s1662_s24, %s15_s24   ;;  %s1613_s23 = sphi %s1660_s23, %s1985_s23   ;;  %s1609_s22 = sphi %s1658_s22, %s1984_s22   ;;  %s1605_s21 = sphi %s1656_s21, %s1983_s21   ;;  %s1601_s20 = sphi %s1654_s20, %s1982_s20   ;;  %s1597_s19 = sphi %s1652_s19, %s1981_s19   ;;  %s1593_s18 = sphi %s1650_s18, %s1980_s18  }
   0x5   : > { %p25_p0 = scmp.ge.s32.totalorder %s24_s25, 2  ;;  %p43_p1 = scmp.ne.s32.totalorder %s1597_s19, %s1593_s18 }
   0x6   : > { %p44_p2 = scmp.eq.s32.totalorder %s1617_s24, 0  ;;  %s36_s30 = sadd.s32 1, %s1597_s19 }
   0x7   : > { %s1987_s25 = smov (%p25_p0, %s24_s25), 0  ;;  %s1989_s26 = smov (!%p25_p0, %s27_s26), %s1613_s23 }
   0x8   : > { %p45_p3 = por %p44_p2, %p43_p1  ;;  %p29_p4 = scmp.ge.s32.totalorder %s1989_s26, 4 }
   0x9   : > { %s32_s27 = ssub.s32 %s1609_s22, %s1987_s25  ;;  %p1207_p6 = scmp.ge.s32.totalorder %s1617_s24, 8 }
   0xa   : > { %s1991_s26 = smov (%p29_p4, %s1989_s26), 0 }
   0xb   : > { %s31_s28 = ssub.s32 %s1613_s23, %s1991_s26  ;;  %193 = sbr.rel (%p1207_p6) target bundleno = 33 (0x21), region = 28 }
   0xc   : > { %s33_s29 = sor.u32 %s32_s27, %s31_s28 }
   0xd   : > { %p34_p5 = scmp.eq.s32.totalorder %s33_s29, 0 }
   0xf   : > { %s1701_s6 = scalar_select %p34_p5, %s1597_s19, %s36_s30  }
  0x12   : > { %196 = sbr.rel (!%p45_p3) target bundleno = 33 (0x21), region = 32  ;;  %s198_s7 = sand.u32 (%p45_p3), 1, %s1597_s19  }
  0x13   : > { %s1210_s8 = sshll.u32 (%p45_p3), %s1609_s22, 1  ;;  %s1208_s9 = sshll.u32 (%p45_p3), %s198_s7, 7 }
  0x14   : > { %s1281_s10 = sshll.u32 (%p45_p3), %s1613_s23, 6  ;;  %s200_s16 = scalar_lea.vmem (%p45_p3), [#allocation3], %s1208_s9 }
  0x15   : > { %s204_s11 = sadd.s32 (%p45_p3), %s1281_s10, %s1210_s8 }
  0x16   : > { %s1212_s12 = sshll.u32 (%p45_p3), %s204_s11, 2 }
  0x17   : > { %s1710_s15 = scalar_lea.vmem (%p45_p3), %s1974_s0, %s1212_s12 }
  0x18   : > { %v264_v0 = vld [vmem:[%s1710_s15] sm:$0xff] (%p45_p3)  ;;  %v266_v1 = vld [vmem:[%s1710_s15 + $0x10] sm:$0xff] (%p45_p3) }
  0x19   : > { %v268_v2 = vld [vmem:[%s1710_s15 + $0x20] sm:$0xff]  ;;  %265 = vst [vmem:[%s200_s16] sm:$0xff] %v264_v0  ;;  %267 = vst [vmem:[%s200_s16 + $0x8] sm:$0xff] %v266_v1  ;;  %v270_v3 = vld [vmem:[%s1710_s15 + $0x30] sm:$0xff] }
  0x1a   : > { %269 = vst [vmem:[%s200_s16 + $0x10] sm:$0xff] %v268_v2  ;;  %v272_v4 = vld [vmem:[%s1710_s15 + $0x40] sm:$0xff]  ;;  %v274_v5 = vld [vmem:[%s1710_s15 + $0x50] sm:$0xff]  ;;  %271 = vst [vmem:[%s200_s16 + $0x18] sm:$0xff] %v270_v3 }
  0x1b   : > { %273 = vst [vmem:[%s200_s16 + $0x20] sm:$0xff] %v272_v4  ;;  %275 = vst [vmem:[%s200_s16 + $0x28] sm:$0xff] %v274_v5  ;;  %v276_v6 = vld [vmem:[%s1710_s15 + $0x60] sm:$0xff]  ;;  %v278_v7 = vld [vmem:[%s1710_s15 + $0x70] sm:$0xff] }
  0x1c   : > { %v280_v8 = vld [vmem:[%s1710_s15 + $0x80] sm:$0xff]  ;;  %277 = vst [vmem:[%s200_s16 + $0x30] sm:$0xff] %v276_v6  ;;  %279 = vst [vmem:[%s200_s16 + $0x38] sm:$0xff] %v278_v7  ;;  %v282_v9 = vld [vmem:[%s1710_s15 + $0x90] sm:$0xff] }
  0x1d   : > { %281 = vst [vmem:[%s200_s16 + $0x40] sm:$0xff] %v280_v8  ;;  %v284_v10 = vld [vmem:[%s1710_s15 + $0xa0] sm:$0xff]  ;;  %v286_v11 = vld [vmem:[%s1710_s15 + $0xb0] sm:$0xff]  ;;  %283 = vst [vmem:[%s200_s16 + $0x48] sm:$0xff] %v282_v9 }
  0x1e   : > { %285 = vst [vmem:[%s200_s16 + $0x50] sm:$0xff] %v284_v10  ;;  %287 = vst [vmem:[%s200_s16 + $0x58] sm:$0xff] %v286_v11  ;;  %v288_v12 = vld [vmem:[%s1710_s15 + $0xc0] sm:$0xff]  ;;  %v290_v13 = vld [vmem:[%s1710_s15 + $0xd0] sm:$0xff] }
  0x1f   : > { %v292_v14 = vld [vmem:[%s1710_s15 + $0xe0] sm:$0xff]  ;;  %289 = vst [vmem:[%s200_s16 + $0x60] sm:$0xff] %v288_v12  ;;  %291 = vst [vmem:[%s200_s16 + $0x68] sm:$0xff] %v290_v13  ;;  %v294_v15 = vld [vmem:[%s1710_s15 + $0xf0] sm:$0xff] }
  0x20   : > { %293 = vst [vmem:[%s200_s16 + $0x70] sm:$0xff] %v292_v14  ;;  %295 = vst [vmem:[%s200_s16 + $0x78] sm:$0xff] %v294_v15 }
  0x21 PF: > { %p1213_p7 = scmp.ge.s32.totalorder %s1617_s24, 1  ;;  %p309_p8 = scmp.lt.s32.totalorder %s1617_s24, 9 }
  0x23   : > { %p310_p9 = pnand %p1213_p7, %p309_p8 }
  0x24   : > { %s316_s17 = sand.u32 (!%p310_p9), 1, %s1593_s18   ;;  %s1215_s27 = sshll.u32 (!%p310_p9), %s1601_s20, 5 }
  0x25   : > { %313 = sbr.rel (%p310_p9) target bundleno = 584 (0x248), region = 74  ;;  %s1214_s28 = sshll.u32 (!%p310_p9), %s316_s17, 7 }
  0x26   : > { %p351_p10 = scmp.lt.s32.totalorder (!%p310_p9), %s1215_s27, 63  ;;  %s1217_s29 = sshll.u32 (!%p310_p9), %s1605_s21, 4 }
  0x27   : > { %p357_p11 = scmp.lt.s32.totalorder (!%p310_p9), %s1217_s29, 63  ;;  %s1743_s18 = scalar_lea.vmem (!%p310_p9), [#allocation3], %s1214_s28 }
  0x28   : > { %p1219_p12 = scmp.ne.s32.totalorder (!%p310_p9), %s1601_s20, 0 }
  0x2c   : > { %s1993_s27 = smov (!%p351_p10, %s1215_s27), 63  ;;  %s1995_s29 = smov (!%p357_p11, %s1217_s29), 63 }
  0x2d   : > { %s1216_s30 = sshll.u32 %s1993_s27, 2  ;;  %s1218_s10 = sshll.u32 %s1995_s29, 3  ;;  %v1619_v16 = vmov (!%p1219_p12), 0.0  }
  0x2e   : > { %s1736_s9 = scalar_lea.vmem %s1975_s1, %s1216_s30  ;;  %s1741_s13 = scalar_lea.vmem %s1979_s5, %s1218_s10  ;;  %367 = vst [vmem:[#allocation2] sm:$0xff] (!%p1219_p12), %v1619_v16  ;;  %368 = vst [vmem:[#allocation2 + $0x8] sm:$0xff] (!%p1219_p12), %v1619_v16 }
  0x2f   : > { %366 = sbr.rel (%p1219_p12) target bundleno = 54 (0x36), region = 82  ;;  %369 = vst [vmem:[#allocation2 + $0x10] sm:$0xff] (!%p1219_p12), %v1619_v16  ;;  %370 = vst [vmem:[#allocation2 + $0x18] sm:$0xff] (!%p1219_p12), %v1619_v16 }
  0x30   : > { %371 = vst [vmem:[#allocation2 + $0x20] sm:$0xff] (!%p1219_p12), %v1619_v16  ;;  %372 = vst [vmem:[#allocation2 + $0x28] sm:$0xff] (!%p1219_p12), %v1619_v16 }
  0x31   : > { %373 = vst [vmem:[#allocation2 + $0x30] sm:$0xff] (!%p1219_p12), %v1619_v16  ;;  %374 = vst [vmem:[#allocation2 + $0x38] sm:$0xff] (!%p1219_p12), %v1619_v16 }
  0x32   : > { %375 = vst [vmem:[#allocation2 + $0x40] sm:$0xff] (!%p1219_p12), %v1619_v16  ;;  %376 = vst [vmem:[#allocation2 + $0x48] sm:$0xff] (!%p1219_p12), %v1619_v16 }
  0x33   : > { %377 = vst [vmem:[#allocation2 + $0x50] sm:$0xff] (!%p1219_p12), %v1619_v16  ;;  %378 = vst [vmem:[#allocation2 + $0x58] sm:$0xff] (!%p1219_p12), %v1619_v16 }
  0x34   : > { %379 = vst [vmem:[#allocation2 + $0x60] sm:$0xff] (!%p1219_p12), %v1619_v16  ;;  %380 = vst [vmem:[#allocation2 + $0x68] sm:$0xff] (!%p1219_p12), %v1619_v16 }
  0x35   : > { %381 = vst [vmem:[#allocation2 + $0x70] sm:$0xff] (!%p1219_p12), %v1619_v16  ;;  %382 = vst [vmem:[#allocation2 + $0x78] sm:$0xff] (!%p1219_p12), %v1619_v16 }
  0x36 PF: > { %v1483_v17 = vld [vmem:[%s1736_s9 + $0x40] sm:$0xff]   ;;  %v1485_v19 = vld [vmem:[%s1736_s9 + $0x48] sm:$0xff]   ;;  %v1487_v21 = vld [vmem:[%s1736_s9 + $0x50] sm:$0xff]   ;;  %p1252_p13 = scmp.ne.s32.totalorder %s1601_s20, 1 }
  0x37   : > { %v1484_v18 = vld [vmem:[%s1736_s9] sm:$0xff]   ;;  %1282 = vmatprep.subr.bf16.mxu0 %v1483_v17  ;;  %1394 = vmatprep.subr.bf16.mxu1 %v1483_v17  ;;  %v1486_v20 = vld [vmem:[%s1736_s9 + $0x8] sm:$0xff]   ;;  %v1488_v22 = vld [vmem:[%s1736_s9 + $0x10] sm:$0xff]  }
  0x38   : > { %1283 = vmatpush3.bf16.msra.mxu0 %v1484_v18  ;;  %1402 = vmatpush3.bf16.msra.mxu1 %v1484_v18  ;;  %v1489_v23 = vld [vmem:[%s1736_s9 + $0x58] sm:$0xff]   ;;  %v1491_v25 = vld [vmem:[%s1736_s9 + $0x60] sm:$0xff]   ;;  %v1493_v27 = vld [vmem:[%s1736_s9 + $0x68] sm:$0xff]  }
  0x39   : > { %1284 = vmatprep.subr.bf16.mxu0 %v1485_v19  ;;  %1395 = vmatprep.subr.bf16.mxu1 %v1485_v19  ;;  %v1490_v24 = vld [vmem:[%s1736_s9 + $0x18] sm:$0xff]   ;;  %v1492_v26 = vld [vmem:[%s1736_s9 + $0x20] sm:$0xff]   ;;  %v1494_v30 = vld [vmem:[%s1736_s9 + $0x28] sm:$0xff]  }
  0x3a   : > { %v1501_v28 = vld [vmem:[%s1743_s18 + $0x4] ss:$8 sps:$4 sm:$0xff]   ;;  %v1495_v31 = vld [vmem:[%s1736_s9 + $0x70] sm:$0xff]   ;;  %v1497_v33 = vld [vmem:[%s1736_s9 + $0x78] sm:$0xff]  }
  0x3b   : > { %v1504_v29 = vld [vmem:[%s1743_s18 + $0x44] ss:$8 sps:$4 sm:$0xff]   ;;  %655 = vmatprep.mubr.bf16.mxu0 %v1501_v28  ;;  %v1496_v32 = vld [vmem:[%s1736_s9 + $0x30] sm:$0xff]   ;;  %v1498_v34 = vld [vmem:[%s1736_s9 + $0x38] sm:$0xff]  }
  0x3c   : > { %1285 = vmatpush3.bf16.msra.mxu0 %v1486_v20  ;;  %1403 = vmatpush3.bf16.msra.mxu1 %v1486_v20  ;;  %v1499_v35 = vld [vmem:[%s1743_s18] ss:$8 sps:$4 sm:$0xff]   ;;  %v1505_v37 = vld [vmem:[%s1743_s18 + $0x14] ss:$8 sps:$4 sm:$0xff]   ;;  %v1509_v39 = vld [vmem:[%s1743_s18 + $0x10] ss:$8 sps:$4 sm:$0xff]  }
  0x3d   : > { %1286 = vmatprep.subr.bf16.mxu0 %v1487_v21  ;;  %1396 = vmatprep.subr.bf16.mxu1 %v1487_v21  ;;  %v1502_v36 = vld [vmem:[%s1743_s18 + $0x40] ss:$8 sps:$4 sm:$0xff]   ;;  %v1507_v38 = vld [vmem:[%s1743_s18 + $0x54] ss:$8 sps:$4 sm:$0xff]   ;;  %v1510_v40 = vld [vmem:[%s1743_s18 + $0x50] ss:$8 sps:$4 sm:$0xff]  }
  0x3e   : > { %687 = vmatprep.mubr.bf16.mxu1 %v1504_v29  ;;  %v1511_v41 = vld [vmem:[%s1743_s18 + $0x24] ss:$8 sps:$4 sm:$0xff]   ;;  %v1515_v43 = vld [vmem:[%s1743_s18 + $0x20] ss:$8 sps:$4 sm:$0xff]   ;;  %v1517_v45 = vld [vmem:[%s1743_s18 + $0x34] ss:$8 sps:$4 sm:$0xff]  }
  0x3f   : > { %v1513_v42 = vld [vmem:[%s1743_s18 + $0x64] ss:$8 sps:$4 sm:$0xff]   ;;  %v1516_v44 = vld [vmem:[%s1743_s18 + $0x60] ss:$8 sps:$4 sm:$0xff]   ;;  %v1519_v46 = vld [vmem:[%s1743_s18 + $0x74] ss:$8 sps:$4 sm:$0xff]  }
  0x40   : > { %1287 = vmatpush3.bf16.msra.mxu0 %v1488_v22  ;;  %1404 = vmatpush3.bf16.msra.mxu1 %v1488_v22  ;;  %v1521_v47 = vld [vmem:[%s1743_s18 + $0x30] ss:$8 sps:$4 sm:$0xff]   ;;  %v383_v51 = vld [vmem:[#allocation2] sm:$0xff]  ;;  %v384_v59 = vld [vmem:[#allocation2 + $0x8] sm:$0xff] }
  0x41   : > { %1288 = vmatprep.subr.bf16.mxu0 %v1489_v23  ;;  %1397 = vmatprep.subr.bf16.mxu1 %v1489_v23  ;;  %v1522_v48 = vld [vmem:[%s1743_s18 + $0x70] ss:$8 sps:$4 sm:$0xff]   ;;  %v391_v53 = vld [vmem:[#allocation2 + $0x40] sm:$0xff]  ;;  %v392_v61 = vld [vmem:[#allocation2 + $0x48] sm:$0xff] }
  0x42   : > { %v385_v7 = vld [vmem:[#allocation2 + $0x10] sm:$0xff]  ;;  %v386_v15 = vld [vmem:[#allocation2 + $0x18] sm:$0xff]  ;;  %v395_v29 = vld [vmem:[#allocation2 + $0x60] sm:$0xff] }
  0x43   : > { %v393_v9 = vld [vmem:[#allocation2 + $0x50] sm:$0xff]  ;;  %v394_v17 = vld [vmem:[#allocation2 + $0x58] sm:$0xff] }
  0x44   : > { %1289 = vmatpush3.bf16.msra.mxu0 %v1490_v24  ;;  %1405 = vmatpush3.bf16.msra.mxu1 %v1490_v24 }
  0x45   : > { %1290 = vmatprep.subr.bf16.mxu0 %v1491_v25  ;;  %1398 = vmatprep.subr.bf16.mxu1 %v1491_v25 }
  0x48   : > { %1291 = vmatpush3.bf16.msra.mxu0 %v1492_v26  ;;  %1406 = vmatpush3.bf16.msra.mxu1 %v1492_v26 }
  0x49   : > { %1292 = vmatprep.subr.bf16.mxu0 %v1493_v27  ;;  %1399 = vmatprep.subr.bf16.mxu1 %v1493_v27  ;;  %v387_v27 = vld [vmem:[#allocation2 + $0x20] sm:$0xff] }
  0x4c   : > { %1293 = vmatpush3.bf16.msra.mxu0 %v1494_v30  ;;  %1407 = vmatpush3.bf16.msra.mxu1 %v1494_v30 }
  0x4d   : > { %1294 = vmatprep.subr.bf16.mxu0 %v1495_v31  ;;  %1400 = vmatprep.subr.bf16.mxu1 %v1495_v31 }
  0x50   : > { %1295 = vmatpush3.bf16.msra.mxu0 %v1496_v32  ;;  %1408 = vmatpush3.bf16.msra.mxu1 %v1496_v32 }
  0x51   : > { %1296 = vmatprep.subr.bf16.mxu0 %v1497_v33  ;;  %1401 = vmatprep.subr.bf16.mxu1 %v1497_v33 }
  0x54   : > { %1297 = vmatpush3.bf16.msra.mxu0 %v1498_v34  ;;  %1409 = vmatpush3.bf16.msra.mxu1 %v1498_v34 }
  0x57   : > { %656 = vmatmul.mubr.bf16.vlgmr.msra.gmra.mrb[0].mxu0 %v1499_v35  ;;  %688 = vmatmul.mubr.bf16.vlgmr.msra.gmra.mrb[0].mxu1 %v1502_v36  ;;  %v388_v35 = vld [vmem:[#allocation2 + $0x28] sm:$0xff] }
  0x58   : > { %663 = vmatprep.mubr.bf16.mxu0 %v1505_v37  ;;  %695 = vmatprep.mubr.bf16.mxu1 %v1507_v38  ;;  %v396_v37 = vld [vmem:[#allocation2 + $0x68] sm:$0xff] }
  0x5f   : > { %664 = vmatmul.mubr.bf16.gmra.mrb[4].mxu0 %v1509_v39  ;;  %696 = vmatmul.mubr.bf16.gmra.mrb[4].mxu1 %v1510_v40 }
  0x60   : > { %671 = vmatprep.mubr.bf16.mxu0 %v1511_v41  ;;  %703 = vmatprep.mubr.bf16.mxu1 %v1513_v42 }
  0x67   : > { %672 = vmatmul.mubr.bf16.gmra.mrb[8].mxu0 %v1515_v43  ;;  %704 = vmatmul.mubr.bf16.gmra.mrb[8].mxu1 %v1516_v44 }
  0x68   : > { %679 = vmatprep.mubr.bf16.mxu0 %v1517_v45  ;;  %711 = vmatprep.mubr.bf16.mxu1 %v1519_v46 }
  0x6f   : > { %680 = vmatmul.mubr.bf16.gmra.mrb[12].mxu0 %v1521_v47  ;;  %712 = vmatmul.mubr.bf16.gmra.mrb[12].mxu1 %v1522_v48  ;;  %v389_v47 = vld [vmem:[#allocation2 + $0x30] sm:$0xff] }
 0x12a   : > { %v1298_v49 = vpop.f32.mrb[0].mxu0  ;;  %v1322_v50 = vpop.f32.mrb[0].mxu1 }
 0x12b   : > { %v1299_v52 = vpop.f32.mrb[1].mxu0  ;;  %v1323_v54 = vpop.f32.mrb[1].mxu1 }
 0x12c   : > { %v1300_v55 = vadd.f32 %v1299_v52, %v1298_v49  ;;  %v1324_v56 = vadd.f32 %v1323_v54, %v1322_v50  ;;  %v1301_v57 = vpop.f32.mrb[2].mxu0  ;;  %v1325_v58 = vpop.f32.mrb[2].mxu1  ;;  %v397_v49 = vld [vmem:[#allocation2 + $0x70] sm:$0xff] }
 0x12d   : > { %v1302_v60 = vpop.f32.mrb[3].mxu0  ;;  %v1326_v62 = vpop.f32.mrb[3].mxu1 }
 0x12e   : > { %v720_v63 = vadd.f32 %v1300_v55, %v383_v51  ;;  %v728_v0 = vadd.f32 %v1324_v56, %v391_v53  ;;  %v1303_v1 = vadd.f32 %v1302_v60, %v1301_v57  ;;  %v1327_v2 = vadd.f32 %v1326_v62, %v1325_v58  ;;  %v390_v55 = vld [vmem:[#allocation2 + $0x38] sm:$0xff] }
 0x12f   : > { %v398_v57 = vld [vmem:[#allocation2 + $0x78] sm:$0xff] }
 0x130   : > { %736 = vst [vmem:[#allocation2] sm:$0xff] %v720_v63  ;;  %744 = vst [vmem:[#allocation2 + $0x40] sm:$0xff] %v728_v0  ;;  %v721_v3 = vadd.f32 %v1303_v1, %v384_v59  ;;  %v729_v4 = vadd.f32 %v1327_v2, %v392_v61  ;;  %v1523_v1 = vld [vmem:[%s1977_s3] sm:$0xff] (!%p1252_p13)   ;;  %v1524_v2 = vld [vmem:[%s1977_s3 + $0x8] sm:$0xff] (!%p1252_p13)  }
 0x131   : > { %1362 = vmatprep.subr.bf16.mxu0 (!%p1252_p13), %v1523_v1  ;;  %1410 = vmatprep.subr.bf16.mxu1 (!%p1252_p13), %v1523_v1 }
 0x132   : > { %737 = vst [vmem:[#allocation2 + $0x8] sm:$0xff] %v721_v3  ;;  %745 = vst [vmem:[#allocation2 + $0x48] sm:$0xff] %v729_v4  ;;  %v1304_v5 = vpop.f32.mrb[4].mxu0  ;;  %v1328_v6 = vpop.f32.mrb[4].mxu1  ;;  %1363 = vmatpush3.bf16.msra.mxu0 (!%p1252_p13), %v1523_v1  ;;  %1418 = vmatpush3.bf16.msra.mxu1 (!%p1252_p13), %v1523_v1  ;;  %v1525_v3 = vld [vmem:[%s1977_s3 + $0x10] sm:$0xff] (!%p1252_p13)   ;;  %v1526_v4 = vld [vmem:[%s1977_s3 + $0x18] sm:$0xff] (!%p1252_p13)  }
 0x133   : > { %v1305_v8 = vpop.f32.mrb[5].mxu0  ;;  %v1329_v10 = vpop.f32.mrb[5].mxu1  ;;  %1364 = vmatprep.subr.bf16.mxu0 (!%p1252_p13), %v1524_v2  ;;  %1411 = vmatprep.subr.bf16.mxu1 (!%p1252_p13), %v1524_v2 }
 0x134   : > { %v1306_v11 = vadd.f32 %v1305_v8, %v1304_v5  ;;  %v1330_v12 = vadd.f32 %v1329_v10, %v1328_v6  ;;  %v1307_v13 = vpop.f32.mrb[6].mxu0  ;;  %v1331_v14 = vpop.f32.mrb[6].mxu1 }
 0x135   : > { %v1308_v16 = vpop.f32.mrb[7].mxu0  ;;  %v1332_v18 = vpop.f32.mrb[7].mxu1 }
 0x136   : > { %v722_v19 = vadd.f32 %v1306_v11, %v385_v7  ;;  %v730_v20 = vadd.f32 %v1330_v12, %v393_v9  ;;  %v1309_v21 = vadd.f32 %v1308_v16, %v1307_v13  ;;  %v1333_v22 = vadd.f32 %v1332_v18, %v1331_v14  ;;  %1365 = vmatpush3.bf16.msra.mxu0 (!%p1252_p13), %v1524_v2 }
 0x137   : > { %1419 = vmatpush3.bf16.msra.mxu1 (!%p1252_p13), %v1524_v2  ;;  %1366 = vmatprep.subr.bf16.mxu0 (!%p1252_p13), %v1525_v3  ;;  %v1791_v5 = vld [vmem:[#allocation2] sm:$0xff] (!%p1252_p13) }
 0x138   : > { %738 = vst [vmem:[#allocation2 + $0x10] sm:$0xff] %v722_v19  ;;  %746 = vst [vmem:[#allocation2 + $0x50] sm:$0xff] %v730_v20  ;;  %v723_v23 = vadd.f32 %v1309_v21, %v386_v15  ;;  %v731_v24 = vadd.f32 %v1333_v22, %v394_v17  ;;  %1412 = vmatprep.subr.bf16.mxu1 (!%p1252_p13), %v1525_v3  ;;  %v772_v7 = vmin.f32 (!%p1252_p13), %v1791_v5, 0.0  ;;  %v1797_v9 = vld [vmem:[#allocation2 + $0x40] sm:$0xff] (!%p1252_p13)  ;;  %vm852_vm0 = vcmp.gt.f32.partialorder (!%p1252_p13), %v1791_v5, 0.0 }
 0x139   : > { %v1793_v6 = vld [vmem:[#allocation2 + $0x8] sm:$0xff] (!%p1252_p13)  ;;  %v780_v11 = vmin.f32 (!%p1252_p13), %v1797_v9, 0.0  ;;  %v1527_v19 = vld [vmem:[%s1977_s3 + $0x20] sm:$0xff] (!%p1252_p13)   ;;  %vm860_vm2 = vcmp.gt.f32.partialorder (!%p1252_p13), %v1797_v9, 0.0 }
 0x13a   : > { %739 = vst [vmem:[#allocation2 + $0x18] sm:$0xff] %v723_v23  ;;  %747 = vst [vmem:[#allocation2 + $0x58] sm:$0xff] %v731_v24  ;;  %v1310_v25 = vpop.f32.mrb[8].mxu0  ;;  %v1334_v26 = vpop.f32.mrb[8].mxu1  ;;  %v773_v8 = vmin.f32 (!%p1252_p13), %v1793_v6, 0.0  ;;  %v1799_v10 = vld [vmem:[#allocation2 + $0x48] sm:$0xff] (!%p1252_p13)  ;;  %1367 = vmatpush3.bf16.msra.mxu0 (!%p1252_p13), %v1525_v3 }
 0x13b   : > { %v1311_v28 = vpop.f32.mrb[9].mxu0  ;;  %v1335_v30 = vpop.f32.mrb[9].mxu1  ;;  %v781_v12 = vmin.f32 (!%p1252_p13), %v1799_v10, 0.0  ;;  %1420 = vmatpush3.bf16.msra.mxu1 (!%p1252_p13), %v1525_v3  ;;  %v788_v15 = vmul.f32 (!%p1252_p13), 1.442695, %v772_v7  ;;  %1368 = vmatprep.subr.bf16.mxu0 (!%p1252_p13), %v1526_v4  ;;  %vm853_vm1 = vcmp.gt.f32.partialorder (!%p1252_p13), %v1793_v6, 0.0 }
 0x13c   : > { %v1312_v31 = vadd.f32 %v1311_v28, %v1310_v25  ;;  %v1336_v32 = vadd.f32 %v1335_v30, %v1334_v26  ;;  %v1313_v33 = vpop.f32.mrb[10].mxu0  ;;  %v1337_v34 = vpop.f32.mrb[10].mxu1  ;;  %v790_v16 = vmul.f32 (!%p1252_p13), 1.442695, %v773_v8  ;;  %1413 = vmatprep.subr.bf16.mxu1 (!%p1252_p13), %v1526_v4  ;;  %v804_v20 = vmul.f32 (!%p1252_p13), 1.442695, %v780_v11 }
 0x13d   : > { %v1314_v36 = vpop.f32.mrb[11].mxu0  ;;  %v1338_v38 = vpop.f32.mrb[11].mxu1  ;;  %v806_v21 = vmul.f32 (!%p1252_p13), 1.442695, %v781_v12  ;;  %1531 = vpow2.f32 (!%p1252_p13), %v788_v15  ;;  %v1528_v30 = vld [vmem:[%s1977_s3 + $0x28] sm:$0xff] (!%p1252_p13)   ;;  %vm861_vm3 = vcmp.gt.f32.partialorder (!%p1252_p13), %v1799_v10, 0.0 }
 0x13e   : > { %v724_v39 = vadd.f32 %v1312_v31, %v387_v27  ;;  %v732_v40 = vadd.f32 %v1336_v32, %v395_v29  ;;  %v1315_v41 = vadd.f32 %v1314_v36, %v1313_v33  ;;  %v1339_v42 = vadd.f32 %v1338_v38, %v1337_v34  ;;  %1369 = vmatpush3.bf16.msra.mxu0 (!%p1252_p13), %v1526_v4  ;;  %v1865_v8 = vld [vmem:[%s1976_s2] ss:$0 sm:$0xff] (!%p1252_p13) }
 0x13f   : > { %v1803_v13 = vld [vmem:[#allocation2 + $0x10] sm:$0xff] (!%p1252_p13)  ;;  %1533 = vpow2.f32 (!%p1252_p13), %v790_v16  ;;  %1421 = vmatpush3.bf16.msra.mxu1 (!%p1252_p13), %v1526_v4  ;;  %1370 = vmatprep.subr.bf16.mxu0 (!%p1252_p13), %v1527_v19 }
 0x140   : > { %740 = vst [vmem:[#allocation2 + $0x20] sm:$0xff] %v724_v39  ;;  %748 = vst [vmem:[#allocation2 + $0x60] sm:$0xff] %v732_v40  ;;  %v725_v43 = vadd.f32 %v1315_v41, %v388_v35  ;;  %v733_v44 = vadd.f32 %v1339_v42, %v396_v37  ;;  %v774_v17 = vmin.f32 (!%p1252_p13), %v1803_v13, 0.0  ;;  %v1812_v23 = vld [vmem:[#allocation2 + $0x50] sm:$0xff] (!%p1252_p13)  ;;  %1535 = vpow2.f32 (!%p1252_p13), %v804_v20  ;;  %1414 = vmatprep.subr.bf16.mxu1 (!%p1252_p13), %v1527_v19 }
 0x141   : > { %v1805_v14 = vld [vmem:[#allocation2 + $0x18] sm:$0xff] (!%p1252_p13)  ;;  %v782_v26 = vmin.f32 (!%p1252_p13), %v1812_v23, 0.0  ;;  %1537 = vpow2.f32 (!%p1252_p13), %v806_v21  ;;  %vm854_vm4 = vcmp.gt.f32.partialorder (!%p1252_p13), %v1803_v13, 0.0  ;;  %vm862_vm6 = vcmp.gt.f32.partialorder (!%p1252_p13), %v1812_v23, 0.0 }
 0x142   : > { %741 = vst [vmem:[#allocation2 + $0x28] sm:$0xff] %v725_v43  ;;  %749 = vst [vmem:[#allocation2 + $0x68] sm:$0xff] %v733_v44  ;;  %v1316_v45 = vpop.f32.mrb[12].mxu0  ;;  %v1340_v46 = vpop.f32.mrb[12].mxu1  ;;  %v775_v18 = vmin.f32 (!%p1252_p13), %v1805_v14, 0.0  ;;  %v1814_v24 = vld [vmem:[#allocation2 + $0x58] sm:$0xff] (!%p1252_p13)  ;;  %1371 = vmatpush3.bf16.msra.mxu0 (!%p1252_p13), %v1527_v19 }
 0x143   : > { %v1317_v48 = vpop.f32.mrb[13].mxu0  ;;  %v1341_v50 = vpop.f32.mrb[13].mxu1  ;;  %v792_v22 = vmul.f32 (!%p1252_p13), 1.442695, %v774_v17  ;;  %v783_v27 = vmin.f32 (!%p1252_p13), %v1814_v24, 0.0  ;;  %1422 = vmatpush3.bf16.msra.mxu1 (!%p1252_p13), %v1527_v19  ;;  %1372 = vmatprep.subr.bf16.mxu0 (!%p1252_p13), %v1528_v30  ;;  %vm855_vm5 = vcmp.gt.f32.partialorder (!%p1252_p13), %v1805_v14, 0.0 }
 0x144   : > { %v1318_v51 = vadd.f32 %v1317_v48, %v1316_v45  ;;  %v1342_v52 = vadd.f32 %v1341_v50, %v1340_v46  ;;  %v1319_v53 = vpop.f32.mrb[14].mxu0  ;;  %v1343_v54 = vpop.f32.mrb[14].mxu1  ;;  %755 = sbr.rel (%p1252_p13) target bundleno = 584 (0x248), region = 86  ;;  %v794_v25 = vmul.f32 (!%p1252_p13), 1.442695, %v775_v18  ;;  %1415 = vmatprep.subr.bf16.mxu1 (!%p1252_p13), %v1528_v30  ;;  %vm863_vm7 = vcmp.gt.f32.partialorder (!%p1252_p13), %v1814_v24, 0.0 }
 0x145   : > { %v1320_v56 = vpop.f32.mrb[15].mxu0  ;;  %v1344_v58 = vpop.f32.mrb[15].mxu1  ;;  %v808_v35 = vmul.f32 (!%p1252_p13), 1.442695, %v782_v26  ;;  %v810_v36 = vmul.f32 (!%p1252_p13), 1.442695, %v783_v27  ;;  %1539 = vpow2.f32 (!%p1252_p13), %v792_v22 }
 0x146   : > { %v726_v59 = vadd.f32 %v1318_v51, %v389_v47  ;;  %v734_v60 = vadd.f32 %v1342_v52, %v397_v49  ;;  %v1321_v61 = vadd.f32 %v1320_v56, %v1319_v53  ;;  %v1345_v62 = vadd.f32 %v1344_v58, %v1343_v54  ;;  %v1529_v47 = vld [vmem:[%s1977_s3 + $0x30] sm:$0xff] (!%p1252_p13)   ;;  %1373 = vmatpush3.bf16.msra.mxu0 (!%p1252_p13), %v1528_v30  ;;  %v1530_v56 = vld [vmem:[%s1977_s3 + $0x38] sm:$0xff] (!%p1252_p13)  }
 0x147   : > { %v1818_v28 = vld [vmem:[#allocation2 + $0x20] sm:$0xff] (!%p1252_p13)  ;;  %1541 = vpow2.f32 (!%p1252_p13), %v794_v25  ;;  %v1532_v54 = vpop.eup (!%p1252_p13), %1531  ;;  %1423 = vmatpush3.bf16.msra.mxu1 (!%p1252_p13), %v1528_v30  ;;  %1374 = vmatprep.subr.bf16.mxu0 (!%p1252_p13), %v1529_v47 }
 0x148   : > { %742 = vst [vmem:[#allocation2 + $0x30] sm:$0xff] %v726_v59  ;;  %750 = vst [vmem:[#allocation2 + $0x70] sm:$0xff] %v734_v60  ;;  %v727_v63 = vadd.f32 %v1321_v61, %v390_v55  ;;  %v735_v0 = vadd.f32 %v1345_v62, %v398_v57  ;;  %v776_v31 = vmin.f32 (!%p1252_p13), %v1818_v28, 0.0  ;;  %v1827_v33 = vld [vmem:[#allocation2 + $0x60] sm:$0xff] (!%p1252_p13)  ;;  %1543 = vpow2.f32 (!%p1252_p13), %v808_v35  ;;  %1416 = vmatprep.subr.bf16.mxu1 (!%p1252_p13), %v1529_v47 }
 0x149   : > { %v1820_v29 = vld [vmem:[#allocation2 + $0x28] sm:$0xff] (!%p1252_p13)  ;;  %v784_v41 = vmin.f32 (!%p1252_p13), %v1827_v33, 0.0  ;;  %1545 = vpow2.f32 (!%p1252_p13), %v810_v36  ;;  %v1534_v55 = vpop.eup (!%p1252_p13), %1533  ;;  %v1253_v57 = vadd.f32 (!%p1252_p13), -1.0, %v1532_v54  ;;  %vm856_vm8 = vcmp.gt.f32.partialorder (!%p1252_p13), %v1818_v28, 0.0 }
 0x14a   : > { %743 = vst [vmem:[#allocation2 + $0x38] sm:$0xff] %v727_v63  ;;  %751 = vst [vmem:[#allocation2 + $0x78] sm:$0xff] %v735_v0  ;;  %v777_v32 = vmin.f32 (!%p1252_p13), %v1820_v29, 0.0  ;;  %v1829_v34 = vld [vmem:[#allocation2 + $0x68] sm:$0xff] (!%p1252_p13)  ;;  %v796_v39 = vmul.f32 (!%p1252_p13), 1.442695, %v776_v31  ;;  %v1536_v60 = vpop.eup (!%p1252_p13), %1535  ;;  %1375 = vmatpush3.bf16.msra.mxu0 (!%p1252_p13), %v1529_v47 }
 0x14b   : > { %v785_v42 = vmin.f32 %v1829_v34, 0.0  ;;  %v812_v48 = vmul.f32 1.442695, %v784_v41  ;;  %v1254_v61 = vadd.f32 -1.0, %v1534_v55  ;;  %v1538_v62 = vpop.eup %1537  ;;  %v836_v63 = vmul.f32 1.6732632, %v1253_v57  ;;  %1424 = vmatpush3.bf16.msra.mxu1 %v1529_v47  ;;  %1376 = vmatprep.subr.bf16.mxu0 %v1530_v56 }
 0x14c   : > { %v798_v40 = vmul.f32 1.442695, %v777_v32  ;;  %1547 = vpow2.f32 %v796_v39  ;;  %v1261_v0 = vadd.f32 -1.0, %v1536_v60  ;;  %v1262_v3 = vadd.f32 -1.0, %v1538_v62  ;;  %1417 = vmatprep.subr.bf16.mxu1 %v1530_v56 }
 0x14d   : > { %v814_v49 = vmul.f32 1.442695, %v785_v42  ;;  %v837_v2 = vmul.f32 1.6732632, %v1254_v61  ;;  %v868_v7 = vsel %vm852_vm0, %v1791_v5, %v836_v63  ;;  %vm857_vm9 = vcmp.gt.f32.partialorder %v1820_v29, 0.0 }
 0x14e   : > { %1549 = vpow2.f32 %v798_v40  ;;  %v844_v11 = vmul.f32 1.6732632, %v1261_v0  ;;  %v884_v17 = vmul.f32 1.050701, %v868_v7  ;;  %v845_v18 = vmul.f32 1.6732632, %v1262_v3  ;;  %1377 = vmatpush3.bf16.msra.mxu0 %v1530_v56 }
 0x14f   : > { %v1831_v37 = vld [vmem:[#allocation2 + $0x30] sm:$0xff]  ;;  %1551 = vpow2.f32 %v812_v48  ;;  %v1540_v1 = vpop.eup %1539  ;;  %v869_v16 = vsel %vm853_vm1, %v1793_v6, %v837_v2  ;;  %1425 = vmatpush3.bf16.msra.mxu1 %v1530_v56  ;;  %vm864_vm10 = vcmp.gt.f32.partialorder %v1827_v33, 0.0  ;;  %vm865_vm11 = vcmp.gt.f32.partialorder %v1829_v34, 0.0 }
 0x150   : > { %v778_v43 = vmin.f32 %v1831_v37, 0.0  ;;  %v1839_v45 = vld [vmem:[#allocation2 + $0x70] sm:$0xff]  ;;  %1553 = vpow2.f32 %v814_v49  ;;  %v1255_v12 = vadd.f32 -1.0, %v1540_v1  ;;  %v885_v20 = vmul.f32 1.050701, %v869_v16 }
 0x151   : > { %v1833_v38 = vld [vmem:[#allocation2 + $0x38] sm:$0xff]  ;;  %v786_v52 = vmin.f32 %v1839_v45, 0.0  ;;  %v1542_v4 = vpop.eup %1541  ;;  %v876_v21 = vsel %vm860_vm2, %v1797_v9, %v844_v11  ;;  %v907_v27 = vadd.f32 %v1865_v8, %v884_v17  ;;  %v877_v6 = vsel %vm861_vm3, %v1799_v10, %v845_v18 }
 0x152   : > { %v779_v44 = vmin.f32 %v1833_v38, 0.0  ;;  %v1841_v46 = vld [vmem:[#allocation2 + $0x78] sm:$0xff]  ;;  %v800_v50 = vmul.f32 1.442695, %v778_v43  ;;  %v1544_v15 = vpop.eup %1543  ;;  %v1256_v5 = vadd.f32 -1.0, %v1542_v4  ;;  %v908_v35 = vadd.f32 %v1865_v8, %v885_v20 }
 0x153   : > { %v787_v53 = vmin.f32 %v1841_v46, 0.0  ;;  %v816_v58 = vmul.f32 1.442695, %v786_v52  ;;  %v1546_v19 = vpop.eup %1545  ;;  %v838_v22 = vmul.f32 1.6732632, %v1255_v12  ;;  %v1263_v25 = vadd.f32 -1.0, %v1544_v15 }
 0x154   : > { %v802_v51 = vmul.f32 1.442695, %v779_v44  ;;  %1555 = vpow2.f32 %v800_v50  ;;  %v892_v30 = vmul.f32 1.050701, %v876_v21  ;;  %v839_v31 = vmul.f32 1.6732632, %v1256_v5 }
 0x155   : > { %v818_v59 = vmul.f32 1.442695, %v787_v53  ;;  %v893_v36 = vmul.f32 1.050701, %v877_v6  ;;  %v870_v9 = vsel %vm854_vm4, %v1803_v13, %v838_v22  ;;  %v1264_v39 = vadd.f32 -1.0, %v1546_v19 }
 0x156   : > { %1557 = vpow2.f32 %v802_v51  ;;  %v1548_v26 = vpop.eup %1547  ;;  %vm858_vm12 = vcmp.gt.f32.partialorder %v1831_v37, 0.0  ;;  %v915_v10 = vadd.f32 %v1865_v8, %v892_v30  ;;  %v871_v41 = vsel %vm855_vm5, %v1805_v14, %v839_v31 }
 0x157   : > { %1559 = vpow2.f32 %v816_v58  ;;  %v886_v42 = vmul.f32 1.050701, %v870_v9  ;;  %v846_v43 = vmul.f32 1.6732632, %v1263_v25  ;;  %v923_v47 = vpack.c.bf16 %v908_v35, %v907_v27 }
 0x158   : > { %1561 = vpow2.f32 %v818_v59  ;;  %v1550_v32 = vpop.eup %1549  ;;  %v916_v48 = vadd.f32 %v1865_v8, %v893_v36  ;;  %v887_v49 = vmul.f32 1.050701, %v871_v41  ;;  %v847_v13 = vmul.f32 1.6732632, %v1264_v39 }
 0x159   : > { %v1552_v40 = vpop.eup %1551  ;;  %vm859_vm13 = vcmp.gt.f32.partialorder %v1833_v38, 0.0  ;;  %v909_v51 = vadd.f32 %v1865_v8, %v886_v42  ;;  %v878_v52 = vsel %vm862_vm6, %v1812_v23, %v846_v43  ;;  %v1257_v53 = vadd.f32 -1.0, %v1548_v26  ;;  %1378 = vmatprep.mubr.bf16.mxu0 %v923_v47 }
 0x15a   : > { %v1554_v44 = vpop.eup %1553  ;;  %v1258_v54 = vadd.f32 -1.0, %v1550_v32  ;;  %v927_v55 = vpack.c.bf16 %v916_v48, %v915_v10  ;;  %v910_v56 = vadd.f32 %v1865_v8, %v887_v49  ;;  %v879_v57 = vsel %vm863_vm7, %v1814_v24, %v847_v13 }
 0x15b   : > { %v894_v58 = vmul.f32 1.050701, %v878_v52  ;;  %vm866_vm14 = vcmp.gt.f32.partialorder %v1839_v45, 0.0  ;;  %v895_v60 = vmul.f32 1.050701, %v879_v57  ;;  %v1265_v1 = vadd.f32 -1.0, %v1552_v40 }
 0x15c   : > { %v840_v61 = vmul.f32 1.6732632, %v1257_v53  ;;  %v841_v62 = vmul.f32 1.6732632, %v1258_v54  ;;  %1386 = vmatprep.mubr.bf16.mxu1 %v927_v55  ;;  %v924_v23 = vpack.c.bf16 %v910_v56, %v909_v51  ;;  %v1266_v2 = vadd.f32 -1.0, %v1554_v44 }
 0x15d   : > { %v917_v0 = vadd.f32 %v1865_v8, %v894_v58  ;;  %v918_v3 = vadd.f32 %v1865_v8, %v895_v60  ;;  %v848_v15 = vmul.f32 1.6732632, %v1265_v1  ;;  %vm867_vm15 = vcmp.gt.f32.partialorder %v1841_v46, 0.0 }
 0x15e   : > { %v1556_v50 = vpop.eup %1555  ;;  %v872_v24 = vsel %vm856_vm8, %v1818_v28, %v840_v61  ;;  %v873_v4 = vsel %vm857_vm9, %v1820_v29, %v841_v62  ;;  %1379 = vmatmul.mubr.bf16.vlgmr.msra.gmra.mrb[0].mxu0 %v924_v23  ;;  %v849_v17 = vmul.f32 1.6732632, %v1266_v2 }
 0x15f   : > { %v1259_v7 = vadd.f32 -1.0, %v1556_v50  ;;  %v888_v11 = vmul.f32 1.050701, %v872_v24  ;;  %v889_v12 = vmul.f32 1.050701, %v873_v4  ;;  %v928_v16 = vpack.c.bf16 %v918_v3, %v917_v0 }
 0x160   : > { %v1558_v14 = vpop.eup %1557  ;;  %v880_v28 = vsel %vm864_vm10, %v1827_v33, %v848_v15  ;;  %v881_v29 = vsel %vm865_vm11, %v1829_v34, %v849_v17 }
 0x161   : > { %v1560_v59 = vpop.eup %1559  ;;  %v1260_v18 = vadd.f32 -1.0, %v1558_v14  ;;  %v842_v5 = vmul.f32 1.6732632, %v1259_v7  ;;  %v911_v19 = vadd.f32 %v1865_v8, %v888_v11  ;;  %v912_v20 = vadd.f32 %v1865_v8, %v889_v12  ;;  %1387 = vmatmul.mubr.bf16.vlgmr.msra.gmra.mrb[0].mxu1 %v928_v16 }
 0x162   : > { %v1562_v63 = vpop.eup %1561  ;;  %v1267_v21 = vadd.f32 -1.0, %v1560_v59  ;;  %v896_v22 = vmul.f32 1.050701, %v880_v28  ;;  %v897_v6 = vmul.f32 1.050701, %v881_v29 }
 0x163   : > { %v843_v25 = vmul.f32 1.6732632, %v1260_v18  ;;  %v874_v26 = vsel %vm858_vm12, %v1831_v37, %v842_v5  ;;  %v925_v27 = vpack.c.bf16 %v912_v20, %v911_v19  ;;  %v1268_v31 = vadd.f32 -1.0, %v1562_v63 }
 0x164   : > { %v890_v30 = vmul.f32 1.050701, %v874_v26  ;;  %v919_v32 = vadd.f32 %v1865_v8, %v896_v22  ;;  %v850_v35 = vmul.f32 1.6732632, %v1267_v21  ;;  %v920_v34 = vadd.f32 %v1865_v8, %v897_v6 }
 0x165   : > { %v875_v33 = vsel %vm859_vm13, %v1833_v38, %v843_v25  ;;  %1382 = vmatprep.mubr.bf16.mxu0 %v925_v27  ;;  %v851_v37 = vmul.f32 1.6732632, %v1268_v31 }
 0x166   : > { %v891_v36 = vmul.f32 1.050701, %v875_v33  ;;  %v913_v9 = vadd.f32 %v1865_v8, %v890_v30  ;;  %v882_v39 = vsel %vm866_vm14, %v1839_v45, %v850_v35  ;;  %v929_v40 = vpack.c.bf16 %v920_v34, %v919_v32  ;;  %v1270_v45 = vld [vmem:[%s1978_s4] ss:$0 sm:$0xff] }
 0x167   : > { %v883_v41 = vsel %vm867_vm15, %v1841_v46, %v851_v37  ;;  %v898_v38 = vmul.f32 1.050701, %v882_v39 }
 0x168   : > { %v914_v10 = vadd.f32 %v1865_v8, %v891_v36  ;;  %v899_v42 = vmul.f32 1.050701, %v883_v41  ;;  %1390 = vmatprep.mubr.bf16.mxu1 %v929_v40 }
 0x169   : > { %v921_v44 = vadd.f32 %v1865_v8, %v898_v38 }
 0x16a   : > { %v926_v43 = vpack.c.bf16 %v914_v10, %v913_v9  ;;  %v922_v47 = vadd.f32 %v1865_v8, %v899_v42 }
 0x16c   : > { %1383 = vmatmul.mubr.bf16.gmra.mrb[4].mxu0 %v926_v43  ;;  %v930_v48 = vpack.c.bf16 %v922_v47, %v921_v44 }
 0x16e   : > { %1391 = vmatmul.mubr.bf16.gmra.mrb[4].mxu1 %v930_v48 }
 0x231   : > { %v1380_v49 = vpop.f32.mrb[0].mxu0 }
 0x232   : > { %v1045_v46 = vadd.f32 %v1380_v49, %v1270_v45  ;;  %v1036_v13 = vpop.f32.mrb[1].mxu0 }
 0x233   : > { %v1037_v50 = vadd.f32 %v1270_v45, %v1036_v13  ;;  %v1381_v51 = vpop.f32.mrb[2].mxu0 }
 0x234   : > { %1101 = vst [vmem:[%s1741_s13 + $0x10] sm:$0xff] %v1045_v46  ;;  %v1388_v52 = vpop.f32.mrb[0].mxu1  ;;  %v1048_v8 = vadd.f32 %v1381_v51, %v1270_v45  ;;  %v1039_v53 = vpop.f32.mrb[3].mxu0 }
 0x235   : > { %v1077_v54 = vadd.f32 %v1388_v52, %v1270_v45  ;;  %1099 = vst [vmem:[%s1741_s13] sm:$0xff] %v1037_v50  ;;  %v1068_v14 = vpop.f32.mrb[1].mxu1  ;;  %v1040_v55 = vadd.f32 %v1270_v45, %v1039_v53 }
 0x236   : > { %v1069_v56 = vadd.f32 %v1270_v45, %v1068_v14  ;;  %1102 = vst [vmem:[%s1741_s13 + $0x18] sm:$0xff] %v1048_v8  ;;  %v1389_v57 = vpop.f32.mrb[2].mxu1 }
 0x237   : > { %1109 = vst [vmem:[%s1741_s13 + $0x50] sm:$0xff] %v1077_v54  ;;  %v1080_v58 = vadd.f32 %v1389_v57, %v1270_v45  ;;  %1100 = vst [vmem:[%s1741_s13 + $0x8] sm:$0xff] %v1040_v55  ;;  %v1071_v59 = vpop.f32.mrb[3].mxu1 }
 0x238   : > { %1107 = vst [vmem:[%s1741_s13 + $0x40] sm:$0xff] %v1069_v56  ;;  %v1072_v60 = vadd.f32 %v1270_v45, %v1071_v59 }
 0x239   : > { %1110 = vst [vmem:[%s1741_s13 + $0x58] sm:$0xff] %v1080_v58 }
 0x23a   : > { %1108 = vst [vmem:[%s1741_s13 + $0x48] sm:$0xff] %v1072_v60 }
 0x23f   : > { %v1384_v61 = vpop.f32.mrb[4].mxu0 }
 0x240   : > { %v1061_v62 = vadd.f32 %v1384_v61, %v1270_v45  ;;  %v1052_v63 = vpop.f32.mrb[5].mxu0 }
 0x241   : > { %v1053_v23 = vadd.f32 %v1270_v45, %v1052_v63  ;;  %v1385_v0 = vpop.f32.mrb[6].mxu0  ;;  %v1392_v1 = vpop.f32.mrb[4].mxu1 }
 0x242   : > { %1105 = vst [vmem:[%s1741_s13 + $0x30] sm:$0xff] %v1061_v62  ;;  %v1064_v2 = vadd.f32 %v1385_v0, %v1270_v45  ;;  %v1055_v3 = vpop.f32.mrb[7].mxu0  ;;  %v1093_v24 = vadd.f32 %v1392_v1, %v1270_v45  ;;  %v1084_v4 = vpop.f32.mrb[5].mxu1 }
 0x243   : > { %1103 = vst [vmem:[%s1741_s13 + $0x20] sm:$0xff] %v1053_v23  ;;  %v1056_v7 = vadd.f32 %v1270_v45, %v1055_v3  ;;  %v1085_v11 = vadd.f32 %v1270_v45, %v1084_v4  ;;  %v1393_v12 = vpop.f32.mrb[6].mxu1 }
 0x244   : > { %1106 = vst [vmem:[%s1741_s13 + $0x38] sm:$0xff] %v1064_v2  ;;  %1113 = vst [vmem:[%s1741_s13 + $0x70] sm:$0xff] %v1093_v24  ;;  %v1096_v15 = vadd.f32 %v1393_v12, %v1270_v45  ;;  %v1087_v16 = vpop.f32.mrb[7].mxu1 }
 0x245   : > { %1104 = vst [vmem:[%s1741_s13 + $0x28] sm:$0xff] %v1056_v7  ;;  %1111 = vst [vmem:[%s1741_s13 + $0x60] sm:$0xff] %v1085_v11  ;;  %v1088_v17 = vadd.f32 %v1270_v45, %v1087_v16 }
 0x246   : > { %1114 = vst [vmem:[%s1741_s13 + $0x78] sm:$0xff] %v1096_v15 }
 0x247   : > { %1112 = vst [vmem:[%s1741_s13 + $0x68] sm:$0xff] %v1088_v17 }
 0x248 PF: > { %s15_s24 = sadd.s32 1, %s1617_s24   ;;  %s1980_s18 = smov %s1597_s19 }
 0x249   : > { %p12_p0 = scmp.ge.s32.totalorder %s15_s24, 10   ;;  %s1981_s19 = smov %s1701_s6 }
 0x24a   : > { %s1982_s20 = smov %s1609_s22  ;;  %s1983_s21 = smov %s1613_s23 }
 0x24b   : > { %s1984_s22 = smov %s1987_s25  ;;  %s1985_s23 = smov %s1991_s26 }
 0x24c   :  { %14 = sbr.rel (!%p12_p0) target bundleno = 4 (0x4), region = 124 }

</bundles_post_ra>
